<compile_context>
chip_gen: v7x
topology: tpu7x:2x2x1
jax: 0.10.0
libtpu: 0.0.40
codegen_flags: <defaults>
</compile_context>

<pallas_src>
import functools

import jax
import jax.numpy as jnp
import numpy as np
from jax.experimental import pallas as pl
from jax.experimental.pallas import tpu as pltpu

EPS = 1e-5
DILATIONS = (1, 2, 3)
P = 3               # halo = max(dilation) * (kernel_size // 2)
MXU_MIN_C = 16      # below this the 1x1 channel mix runs as exact-f32 VPU FMAs


def _vmem_limit_bytes():
    """3/4 of this chip's per-core VMEM (capped at 96 MiB); safe 48 MiB fallback."""
    try:
        cap = int(pltpu.get_tpu_info().vmem_capacity_bytes)
        if cap <= 0:
            raise ValueError("bad vmem capacity")
        return int(min((cap * 3) // 4, 96 * 1024 * 1024))
    except Exception:
        return 48 * 1024 * 1024   # fits v7x's 64 MiB/core physical VMEM


def _lane_shift(x, off):
    """y[:, k] = x[:, (k + off) % L] via two static lane slices + concat.

    Only interior positions (which never wrap for |off| <= P*Wp + P < L) are used.
    """
    if off == 0:
        return x
    return jnp.concatenate([x[:, off:], x[:, :off]], axis=1)


def _mck_stage1_kernel(x_ref, wdw_ref, w1t_ref, y_ref, stats_ref, *, C, H, W, Wp):
    """One padded image: 3 depthwise dilated 3x3 convs + fused 1x1 conv + BN partials.

    x_ref:    (C, Hp*Wp)  zero-padded image, flattened row-major over (Hp, Wp).
    wdw_ref:  (C, 27)     depthwise taps; column t = d*9 + m*3 + n.
    w1t_ref:  (C, 3C)     1x1 weights; column k = d*C + ci.
    y_ref:    (C, H*W)    pre-BN output (lane-dense, interior only).
    stats_ref:(C, 2)      per-image per-channel (sum, sum_sq) over H*W.
    """
    xv = x_ref[...]                        # (C, Lp) f32
    wdw = wdw_ref[...]                     # (C, 27)
    w1t = w1t_ref[...]                     # (C, 3C)

    # Depthwise stage: every tap is a static lane shift of the flattened padded
    # plane (XLU slot) + a full-lane-width FMA (VPU).  Border lanes hold junk that
    # is discarded by the interior extraction below.
    feats = []
    for d_idx, d in enumerate(DILATIONS):
        feat = jnp.zeros_like(xv)
        for m in range(3):
            for n in range(3):
                t = d_idx * 9 + m * 3 + n
                off = (m - 1) * d * Wp + (n - 1) * d
                feat = feat + _lane_shift(xv, off) * wdw[:, t:t + 1]
        feats.append(feat)

    # 1x1 channel mix over the implicit 3C concat.
    if C >= MXU_MIN_C:
        # Single fused MXU matmul (K = 3C), bf16 inputs + f32 accumulation.
        # TODO(synk): bf16 inputs trade ~1e-3 relative accuracy vs the f32 reference.
        cat = jnp.concatenate(feats, axis=0).astype(jnp.bfloat16)        # (3C, Lp)
        acc = jnp.dot(w1t.astype(jnp.bfloat16), cat,
                      preferred_element_type=jnp.float32)                 # (C, Lp)
    else:
        # Tiny C: exact f32 VPU FMAs (MXU would be a few % utilized).
        acc = jnp.zeros_like(xv)
        for d_idx in range(3):
            for ci in range(C):
                k = d_idx * C + ci
                acc = acc + feats[d_idx][ci:ci + 1, :] * w1t[:, k:k + 1]

    # Extract the interior (drop the halo ring) into the lane-dense (C, H*W) output
    # block and accumulate per-channel BatchNorm partial sums along the way.
    s1 = jnp.zeros((C, 1), jnp.float32)
    s2 = jnp.zeros((C, 1), jnp.float32)
    for i in range(H):
        src = (i + P) * Wp + P
        row = acc[:, src:src + W]                       # (C, W) interior row i
        y_ref[:, i * W:(i + 1) * W] = row
        s1 = s1 + jnp.sum(row, axis=1, keepdims=True)
        s2 = s2 + jnp.sum(row * row, axis=1, keepdims=True)
    stats_ref[...] = jnp.concatenate([s1, s2], axis=1)   # (C, 2), once per image


def _bn_apply_kernel(y_ref, scale_ref, shift_ref, out_ref):
    """Lane-dense per-image normalize: out = y * scale + shift (NCHW layout)."""
    out_ref[...] = y_ref[...] * scale_ref[...] + shift_ref[...]


@jax.jit
def mck_forward(x_nchw, wdw, w1, gamma, beta):
    """x_nchw: (B, C, H, W). wdw: (3,3,3,C). w1: (3C, C). gamma/beta: (C,).

    Returns (B, C, H, W), matching MultiScaleContextKernel.forward (training-mode BN).
    """
    B, C, H, W = x_nchw.shape
    Hp, Wp = H + 2 * P, W + 2 * P
    Lp, HW = Hp * Wp, H * W

    # Single zero-pad of the +/-P halo (H and W only), then a free bitcast reshape to
    # the lane-dense flattened layout.  No transposes anywhere.
    xpad = jnp.pad(x_nchw.astype(jnp.float32),
                   ((0, 0), (0, 0), (P, P), (P, P))).reshape(B, C, Lp)

    wdw_k = jnp.transpose(wdw.astype(jnp.float32).reshape(27, C))   # (C, 27)
    w1t = jnp.transpose(w1.astype(jnp.float32))                      # (C, 3C)

    vmem_limit = _vmem_limit_bytes()
    kernel1 = functools.partial(_mck_stage1_kernel, C=C, H=H, W=W, Wp=Wp)
    y, stats = pl.pallas_call(
        kernel1,
        grid=(B,),
        in_specs=[
            pl.BlockSpec((None, C, Lp), lambda b: (b, 0, 0)),   # whole padded image
            pl.BlockSpec((C, 27), lambda b: (0, 0)),            # depthwise taps
            pl.BlockSpec((C, 3 * C), lambda b: (0, 0)),         # 1x1 weights (transposed)
        ],
        out_specs=[
            pl.BlockSpec((None, C, HW), lambda b: (b, 0, 0)),
            pl.BlockSpec((None, C, 2), lambda b: (b, 0, 0)),
        ],
        out_shape=[
            jax.ShapeDtypeStruct((B, C, HW), jnp.float32),   # pre-BN y (lane-dense NCHW)
            jax.ShapeDtypeStruct((B, C, 2), jnp.float32),    # per-image (sum, sum_sq)
        ],
        compiler_params=pltpu.CompilerParams(
            dimension_semantics=("parallel",),
            vmem_limit_bytes=vmem_limit),
    )(xpad, wdw_k, w1t)

    # Fold global (biased, training-mode) batch statistics into per-channel scale/shift.
    s = jnp.sum(stats, axis=0)                          # (C, 2)
    n = float(B * H * W)
    mean = s[:, 0] / n
    var = jnp.maximum(s[:, 1] / n - mean * mean, 0.0)   # biased variance
    scale_c = gamma.astype(jnp.float32) * jax.lax.rsqrt(var + EPS)
    shift_c = beta.astype(jnp.float32) - mean * scale_c
    scale = scale_c.reshape(C, 1)
    shift = shift_c.reshape(C, 1)

    # Stage 2: lane-dense BatchNorm apply, one whole image per grid step, NCHW output.
    out = pl.pallas_call(
        _bn_apply_kernel,
        grid=(B,),
        in_specs=[
            pl.BlockSpec((None, C, HW), lambda b: (b, 0, 0)),
            pl.BlockSpec((C, 1), lambda b: (0, 0)),
            pl.BlockSpec((C, 1), lambda b: (0, 0)),
        ],
        out_specs=pl.BlockSpec((None, C, HW), lambda b: (b, 0, 0)),
        out_shape=jax.ShapeDtypeStruct((B, C, HW), jnp.float32),
        compiler_params=pltpu.CompilerParams(
            dimension_semantics=("parallel",),
            vmem_limit_bytes=vmem_limit),
    )(y, scale, shift)

    return out.reshape(B, C, H, W)    # free reshape; already NCHW


def reference_forward(x_nchw, wdw, w1, gamma, beta):
    """Pure-JAX f32 reference matching the PyTorch module forward (training-mode BN)."""
    B, C, H, W = x_nchw.shape
    x = jnp.transpose(x_nchw, (0, 2, 3, 1)).astype(jnp.float32)
    feats = []
    for di, d in enumerate(DILATIONS):
        rhs = wdw[di][:, :, None, :]                                  # (3,3,1,C)
        yv = jax.lax.conv_general_dilated(
            x, rhs, window_strides=(1, 1), padding=[(d, d), (d, d)],
            rhs_dilation=(d, d), dimension_numbers=('NHWC', 'HWIO', 'NHWC'),
            feature_group_count=C, precision=jax.lax.Precision.HIGHEST)
        feats.append(yv)
    cat = jnp.concatenate(feats, axis=-1)
    yv = jnp.einsum('bhwk,kc->bhwc', cat, w1, precision=jax.lax.Precision.HIGHEST)
    mean = jnp.mean(yv, axis=(0, 1, 2), keepdims=True)
    var = jnp.mean((yv - mean) ** 2, axis=(0, 1, 2), keepdims=True)
    out = (yv - mean) * jax.lax.rsqrt(var + EPS) * gamma.reshape(1, 1, 1, C) \
        + beta.reshape(1, 1, 1, C)
    return jnp.transpose(out, (0, 3, 1, 2))


if __name__ == "__main__":
    key = jax.random.PRNGKey(0)
    B, C, H, W = 2, 4, 16, 16
    k_x, k_dw, k_w1, k_g, k_b = jax.random.split(key, 5)

    x = jax.random.normal(k_x, (B, C, H, W), jnp.float32)
    # Synthetic parameters (PyTorch shapes: depthwise (C,1,3,3) x3 -> (3,3,3,C);
    # 1x1 conv (C,3C,1,1) -> w1 (3C,C) with w1[k, c] = conv1x1.weight[c, k]; BN (C,)).
    wdw = jax.random.normal(k_dw, (3, 3, 3, C), jnp.float32) * (1.0 / 3.0)
    w1 = jax.random.normal(k_w1, (3 * C, C), jnp.float32) * (1.0 / np.sqrt(3 * C))
    gamma = 1.0 + 0.1 * jax.random.normal(k_g, (C,), jnp.float32)
    beta = 0.1 * jax.random.normal(k_b, (C,), jnp.float32)

    out = mck_forward(x, wdw, w1, gamma, beta)
    jax.block_until_ready(out)

    ref = reference_forward(x, wdw, w1, gamma, beta)
    # C=4 < MXU_MIN_C -> exact f32 VPU channel-mix path; matches the f32 reference.
    np.testing.assert_allclose(np.asarray(out), np.asarray(ref), atol=2e-3, rtol=2e-3)
    print("KERNEL_OK")
</pallas_src>

<mosaic_0001>
module attributes {stable_mosaic.version = 11 : i64} {
  func.func @_bn_apply_kernel(%arg0: i32, %arg1: memref<1x4x256xf32, #tpu.memory_space<vmem>>, %arg2: memref<4x1xf32, #tpu.memory_space<vmem>>, %arg3: memref<4x1xf32, #tpu.memory_space<vmem>>, %arg4: memref<1x4x256xf32, #tpu.memory_space<vmem>>) attributes {dimension_semantics = [#tpu.dimension_semantics<parallel>], iteration_bounds = array<i64: 2>, scalar_prefetch = 0 : i64, scratch_operands = 0 : i64, tpu.core_type = #tpu.core_type<tc>, window_params = [{transform_indices = @transform_0, window_bounds = array<i64: 1, 4, 256>}, {pipeline_mode = #tpu.pipeline_mode<synchronous>, transform_indices = @transform_1, window_bounds = array<i64: 4, 1>}, {pipeline_mode = #tpu.pipeline_mode<synchronous>, transform_indices = @transform_2, window_bounds = array<i64: 4, 1>}, {transform_indices = @transform_3, window_bounds = array<i64: 1, 4, 256>}]} {
    %c0 = arith.constant 0 : index
    %c0_0 = arith.constant 0 : index
    %c0_1 = arith.constant 0 : index
    %0 = vector.load %arg1[%c0, %c0_0, %c0_1] : memref<1x4x256xf32, #tpu.memory_space<vmem>>, vector<1x4x256xf32>
    %1 = vector.shape_cast %0 : vector<1x4x256xf32> to vector<4x256xf32>
    %c0_2 = arith.constant 0 : index
    %c0_3 = arith.constant 0 : index
    %2 = vector.load %arg2[%c0_2, %c0_3] : memref<4x1xf32, #tpu.memory_space<vmem>>, vector<4x1xf32>
    %3 = vector.broadcast %2 : vector<4x1xf32> to vector<4x256xf32>
    %4 = arith.mulf %1, %3 : vector<4x256xf32>
    %c0_4 = arith.constant 0 : index
    %c0_5 = arith.constant 0 : index
    %5 = vector.load %arg3[%c0_4, %c0_5] : memref<4x1xf32, #tpu.memory_space<vmem>>, vector<4x1xf32>
    %6 = vector.broadcast %5 : vector<4x1xf32> to vector<4x256xf32>
    %7 = arith.addf %4, %6 : vector<4x256xf32>
    %c0_6 = arith.constant 0 : index
    %c0_7 = arith.constant 0 : index
    %c0_8 = arith.constant 0 : index
    %8 = vector.load %arg4[%c0_6, %c0_7, %c0_8] : memref<1x4x256xf32, #tpu.memory_space<vmem>>, vector<1x4x256xf32>
    %9 = vector.shape_cast %8 : vector<1x4x256xf32> to vector<4x256xf32>
    %10 = vector.shape_cast %7 : vector<4x256xf32> to vector<1x4x256xf32>
    tpu.vector_store %arg4[%c0_6, %c0_7, %c0_8], %10 {strides = array<i32>} : memref<1x4x256xf32, #tpu.memory_space<vmem>>, vector<1x4x256xf32>,
    return
  }
  func.func @transform_0(%arg0: i32) -> (i32, i32, i32) {
    %c0_i32 = arith.constant 0 : i32
    %c0_i32_0 = arith.constant 0 : i32
    %c0_i32_1 = arith.constant 0 : i32
    return %arg0, %c0_i32, %c0_i32_0 : i32, i32, i32
  }
  func.func @transform_1(%arg0: i32) -> (i32, i32) {
    %c0_i32 = arith.constant 0 : i32
    %c0_i32_0 = arith.constant 0 : i32
    %c0_i32_1 = arith.constant 0 : i32
    return %c0_i32, %c0_i32_0 : i32, i32
  }
  func.func @transform_2(%arg0: i32) -> (i32, i32) {
    %c0_i32 = arith.constant 0 : i32
    %c0_i32_0 = arith.constant 0 : i32
    %c0_i32_1 = arith.constant 0 : i32
    return %c0_i32, %c0_i32_0 : i32, i32
  }
  func.func @transform_3(%arg0: i32) -> (i32, i32, i32) {
    %c0_i32 = arith.constant 0 : i32
    %c0_i32_0 = arith.constant 0 : i32
    %c0_i32_1 = arith.constant 0 : i32
    return %arg0, %c0_i32, %c0_i32_0 : i32, i32, i32
  }
}

module attributes {stable_mosaic.version = 11 : i64} {
  func.func @_mck_stage1_kernel(%arg0: i32, %arg1: memref<1x4x484xf32, #tpu.memory_space<vmem>>, %arg2: memref<4x27xf32, #tpu.memory_space<vmem>>, %arg3: memref<4x12xf32, #tpu.memory_space<vmem>>, %arg4: memref<1x4x256xf32, #tpu.memory_space<vmem>>, %arg5: memref<1x4x2xf32, #tpu.memory_space<vmem>>) attributes {dimension_semantics = [#tpu.dimension_semantics<parallel>], iteration_bounds = array<i64: 2>, scalar_prefetch = 0 : i64, scratch_operands = 0 : i64, tpu.core_type = #tpu.core_type<tc>, window_params = [{transform_indices = @transform_0, window_bounds = array<i64: 1, 4, 484>}, {pipeline_mode = #tpu.pipeline_mode<synchronous>, transform_indices = @transform_1, window_bounds = array<i64: 4, 27>}, {pipeline_mode = #tpu.pipeline_mode<synchronous>, transform_indices = @transform_2, window_bounds = array<i64: 4, 12>}, {transform_indices = @transform_3, window_bounds = array<i64: 1, 4, 256>}, {transform_indices = @transform_4, window_bounds = array<i64: 1, 4, 2>}]} {
    %c0 = arith.constant 0 : index
    %c0_0 = arith.constant 0 : index
    %c0_1 = arith.constant 0 : index
    %0 = vector.load %arg1[%c0, %c0_0, %c0_1] : memref<1x4x484xf32, #tpu.memory_space<vmem>>, vector<1x4x484xf32>
    %1 = vector.shape_cast %0 : vector<1x4x484xf32> to vector<4x484xf32>
    %c0_2 = arith.constant 0 : index
    %c0_3 = arith.constant 0 : index
    %2 = vector.load %arg2[%c0_2, %c0_3] : memref<4x27xf32, #tpu.memory_space<vmem>>, vector<4x27xf32>
    %c0_4 = arith.constant 0 : index
    %c0_5 = arith.constant 0 : index
    %3 = vector.load %arg3[%c0_4, %c0_5] : memref<4x12xf32, #tpu.memory_space<vmem>>, vector<4x12xf32>
    %cst = arith.constant 0.000000e+00 : f32
    %4 = vector.broadcast %cst : f32 to vector<4x484xf32>
    %5 = vector.extract_strided_slice %1 {offsets = [0, 461], sizes = [4, 23], strides = [1, 1]} : vector<4x484xf32> to vector<4x23xf32>
    %6 = vector.extract_strided_slice %1 {offsets = [0, 0], sizes = [4, 461], strides = [1, 1]} : vector<4x484xf32> to vector<4x461xf32>
    %7 = tpu.concatenate %5, %6 in 1 : vector<4x23xf32>, vector<4x461xf32> -> vector<4x484xf32>
    %8 = vector.extract_strided_slice %2 {offsets = [0, 0], sizes = [4, 1], strides = [1, 1]} : vector<4x27xf32> to vector<4x1xf32>
    %9 = vector.broadcast %8 : vector<4x1xf32> to vector<4x484xf32>
    %10 = arith.mulf %7, %9 : vector<4x484xf32>
    %11 = arith.addf %4, %10 : vector<4x484xf32>
    %12 = vector.extract_strided_slice %1 {offsets = [0, 462], sizes = [4, 22], strides = [1, 1]} : vector<4x484xf32> to vector<4x22xf32>
    %13 = vector.extract_strided_slice %1 {offsets = [0, 0], sizes = [4, 462], strides = [1, 1]} : vector<4x484xf32> to vector<4x462xf32>
    %14 = tpu.concatenate %12, %13 in 1 : vector<4x22xf32>, vector<4x462xf32> -> vector<4x484xf32>
    %15 = vector.extract_strided_slice %2 {offsets = [0, 1], sizes = [4, 1], strides = [1, 1]} : vector<4x27xf32> to vector<4x1xf32>
    %16 = vector.broadcast %15 : vector<4x1xf32> to vector<4x484xf32>
    %17 = arith.mulf %14, %16 : vector<4x484xf32>
    %18 = arith.addf %11, %17 : vector<4x484xf32>
    %19 = vector.extract_strided_slice %1 {offsets = [0, 463], sizes = [4, 21], strides = [1, 1]} : vector<4x484xf32> to vector<4x21xf32>
    %20 = vector.extract_strided_slice %1 {offsets = [0, 0], sizes = [4, 463], strides = [1, 1]} : vector<4x484xf32> to vector<4x463xf32>
    %21 = tpu.concatenate %19, %20 in 1 : vector<4x21xf32>, vector<4x463xf32> -> vector<4x484xf32>
    %22 = vector.extract_strided_slice %2 {offsets = [0, 2], sizes = [4, 1], strides = [1, 1]} : vector<4x27xf32> to vector<4x1xf32>
    %23 = vector.broadcast %22 : vector<4x1xf32> to vector<4x484xf32>
    %24 = arith.mulf %21, %23 : vector<4x484xf32>
    %25 = arith.addf %18, %24 : vector<4x484xf32>
    %26 = vector.extract_strided_slice %1 {offsets = [0, 483], sizes = [4, 1], strides = [1, 1]} : vector<4x484xf32> to vector<4x1xf32>
    %27 = vector.extract_strided_slice %1 {offsets = [0, 0], sizes = [4, 483], strides = [1, 1]} : vector<4x484xf32> to vector<4x483xf32>
    %28 = tpu.concatenate %26, %27 in 1 : vector<4x1xf32>, vector<4x483xf32> -> vector<4x484xf32>
    %29 = vector.extract_strided_slice %2 {offsets = [0, 3], sizes = [4, 1], strides = [1, 1]} : vector<4x27xf32> to vector<4x1xf32>
    %30 = vector.broadcast %29 : vector<4x1xf32> to vector<4x484xf32>
    %31 = arith.mulf %28, %30 : vector<4x484xf32>
    %32 = arith.addf %25, %31 : vector<4x484xf32>
    %33 = vector.extract_strided_slice %2 {offsets = [0, 4], sizes = [4, 1], strides = [1, 1]} : vector<4x27xf32> to vector<4x1xf32>
    %34 = vector.broadcast %33 : vector<4x1xf32> to vector<4x484xf32>
    %35 = arith.mulf %1, %34 : vector<4x484xf32>
    %36 = arith.addf %32, %35 : vector<4x484xf32>
    %37 = vector.extract_strided_slice %1 {offsets = [0, 1], sizes = [4, 483], strides = [1, 1]} : vector<4x484xf32> to vector<4x483xf32>
    %38 = vector.extract_strided_slice %1 {offsets = [0, 0], sizes = [4, 1], strides = [1, 1]} : vector<4x484xf32> to vector<4x1xf32>
    %39 = tpu.concatenate %37, %38 in 1 : vector<4x483xf32>, vector<4x1xf32> -> vector<4x484xf32>
    %40 = vector.extract_strided_slice %2 {offsets = [0, 5], sizes = [4, 1], strides = [1, 1]} : vector<4x27xf32> to vector<4x1xf32>
    %41 = vector.broadcast %40 : vector<4x1xf32> to vector<4x484xf32>
    %42 = arith.mulf %39, %41 : vector<4x484xf32>
    %43 = arith.addf %36, %42 : vector<4x484xf32>
    %44 = vector.extract_strided_slice %1 {offsets = [0, 21], sizes = [4, 463], strides = [1, 1]} : vector<4x484xf32> to vector<4x463xf32>
    %45 = vector.extract_strided_slice %1 {offsets = [0, 0], sizes = [4, 21], strides = [1, 1]} : vector<4x484xf32> to vector<4x21xf32>
    %46 = tpu.concatenate %44, %45 in 1 : vector<4x463xf32>, vector<4x21xf32> -> vector<4x484xf32>
    %47 = vector.extract_strided_slice %2 {offsets = [0, 6], sizes = [4, 1], strides = [1, 1]} : vector<4x27xf32> to vector<4x1xf32>
    %48 = vector.broadcast %47 : vector<4x1xf32> to vector<4x484xf32>
    %49 = arith.mulf %46, %48 : vector<4x484xf32>
    %50 = arith.addf %43, %49 : vector<4x484xf32>
    %51 = vector.extract_strided_slice %1 {offsets = [0, 22], sizes = [4, 462], strides = [1, 1]} : vector<4x484xf32> to vector<4x462xf32>
    %52 = vector.extract_strided_slice %1 {offsets = [0, 0], sizes = [4, 22], strides = [1, 1]} : vector<4x484xf32> to vector<4x22xf32>
    %53 = tpu.concatenate %51, %52 in 1 : vector<4x462xf32>, vector<4x22xf32> -> vector<4x484xf32>
    %54 = vector.extract_strided_slice %2 {offsets = [0, 7], sizes = [4, 1], strides = [1, 1]} : vector<4x27xf32> to vector<4x1xf32>
    %55 = vector.broadcast %54 : vector<4x1xf32> to vector<4x484xf32>
    %56 = arith.mulf %53, %55 : vector<4x484xf32>
    %57 = arith.addf %50, %56 : vector<4x484xf32>
    %58 = vector.extract_strided_slice %1 {offsets = [0, 23], sizes = [4, 461], strides = [1, 1]} : vector<4x484xf32> to vector<4x461xf32>
    %59 = vector.extract_strided_slice %1 {offsets = [0, 0], sizes = [4, 23], strides = [1, 1]} : vector<4x484xf32> to vector<4x23xf32>
    %60 = tpu.concatenate %58, %59 in 1 : vector<4x461xf32>, vector<4x23xf32> -> vector<4x484xf32>
    %61 = vector.extract_strided_slice %2 {offsets = [0, 8], sizes = [4, 1], strides = [1, 1]} : vector<4x27xf32> to vector<4x1xf32>
    %62 = vector.broadcast %61 : vector<4x1xf32> to vector<4x484xf32>
    %63 = arith.mulf %60, %62 : vector<4x484xf32>
    %64 = arith.addf %57, %63 : vector<4x484xf32>
    %cst_6 = arith.constant 0.000000e+00 : f32
    %65 = vector.broadcast %cst_6 : f32 to vector<4x484xf32>
    %66 = vector.extract_strided_slice %1 {offsets = [0, 438], sizes = [4, 46], strides = [1, 1]} : vector<4x484xf32> to vector<4x46xf32>
    %67 = vector.extract_strided_slice %1 {offsets = [0, 0], sizes = [4, 438], strides = [1, 1]} : vector<4x484xf32> to vector<4x438xf32>
    %68 = tpu.concatenate %66, %67 in 1 : vector<4x46xf32>, vector<4x438xf32> -> vector<4x484xf32>
    %69 = vector.extract_strided_slice %2 {offsets = [0, 9], sizes = [4, 1], strides = [1, 1]} : vector<4x27xf32> to vector<4x1xf32>
    %70 = vector.broadcast %69 : vector<4x1xf32> to vector<4x484xf32>
    %71 = arith.mulf %68, %70 : vector<4x484xf32>
    %72 = arith.addf %65, %71 : vector<4x484xf32>
    %73 = vector.extract_strided_slice %1 {offsets = [0, 440], sizes = [4, 44], strides = [1, 1]} : vector<4x484xf32> to vector<4x44xf32>
    %74 = vector.extract_strided_slice %1 {offsets = [0, 0], sizes = [4, 440], strides = [1, 1]} : vector<4x484xf32> to vector<4x440xf32>
    %75 = tpu.concatenate %73, %74 in 1 : vector<4x44xf32>, vector<4x440xf32> -> vector<4x484xf32>
    %76 = vector.extract_strided_slice %2 {offsets = [0, 10], sizes = [4, 1], strides = [1, 1]} : vector<4x27xf32> to vector<4x1xf32>
    %77 = vector.broadcast %76 : vector<4x1xf32> to vector<4x484xf32>
    %78 = arith.mulf %75, %77 : vector<4x484xf32>
    %79 = arith.addf %72, %78 : vector<4x484xf32>
    %80 = vector.extract_strided_slice %1 {offsets = [0, 442], sizes = [4, 42], strides = [1, 1]} : vector<4x484xf32> to vector<4x42xf32>
    %81 = vector.extract_strided_slice %1 {offsets = [0, 0], sizes = [4, 442], strides = [1, 1]} : vector<4x484xf32> to vector<4x442xf32>
    %82 = tpu.concatenate %80, %81 in 1 : vector<4x42xf32>, vector<4x442xf32> -> vector<4x484xf32>
    %83 = vector.extract_strided_slice %2 {offsets = [0, 11], sizes = [4, 1], strides = [1, 1]} : vector<4x27xf32> to vector<4x1xf32>
    %84 = vector.broadcast %83 : vector<4x1xf32> to vector<4x484xf32>
    %85 = arith.mulf %82, %84 : vector<4x484xf32>
    %86 = arith.addf %79, %85 : vector<4x484xf32>
    %87 = vector.extract_strided_slice %1 {offsets = [0, 482], sizes = [4, 2], strides = [1, 1]} : vector<4x484xf32> to vector<4x2xf32>
    %88 = vector.extract_strided_slice %1 {offsets = [0, 0], sizes = [4, 482], strides = [1, 1]} : vector<4x484xf32> to vector<4x482xf32>
    %89 = tpu.concatenate %87, %88 in 1 : vector<4x2xf32>, vector<4x482xf32> -> vector<4x484xf32>
    %90 = vector.extract_strided_slice %2 {offsets = [0, 12], sizes = [4, 1], strides = [1, 1]} : vector<4x27xf32> to vector<4x1xf32>
    %91 = vector.broadcast %90 : vector<4x1xf32> to vector<4x484xf32>
    %92 = arith.mulf %89, %91 : vector<4x484xf32>
    %93 = arith.addf %86, %92 : vector<4x484xf32>
    %94 = vector.extract_strided_slice %2 {offsets = [0, 13], sizes = [4, 1], strides = [1, 1]} : vector<4x27xf32> to vector<4x1xf32>
    %95 = vector.broadcast %94 : vector<4x1xf32> to vector<4x484xf32>
    %96 = arith.mulf %1, %95 : vector<4x484xf32>
    %97 = arith.addf %93, %96 : vector<4x484xf32>
    %98 = vector.extract_strided_slice %1 {offsets = [0, 2], sizes = [4, 482], strides = [1, 1]} : vector<4x484xf32> to vector<4x482xf32>
    %99 = vector.extract_strided_slice %1 {offsets = [0, 0], sizes = [4, 2], strides = [1, 1]} : vector<4x484xf32> to vector<4x2xf32>
    %100 = tpu.concatenate %98, %99 in 1 : vector<4x482xf32>, vector<4x2xf32> -> vector<4x484xf32>
    %101 = vector.extract_strided_slice %2 {offsets = [0, 14], sizes = [4, 1], strides = [1, 1]} : vector<4x27xf32> to vector<4x1xf32>
    %102 = vector.broadcast %101 : vector<4x1xf32> to vector<4x484xf32>
    %103 = arith.mulf %100, %102 : vector<4x484xf32>
    %104 = arith.addf %97, %103 : vector<4x484xf32>
    %105 = vector.extract_strided_slice %1 {offsets = [0, 42], sizes = [4, 442], strides = [1, 1]} : vector<4x484xf32> to vector<4x442xf32>
    %106 = vector.extract_strided_slice %1 {offsets = [0, 0], sizes = [4, 42], strides = [1, 1]} : vector<4x484xf32> to vector<4x42xf32>
    %107 = tpu.concatenate %105, %106 in 1 : vector<4x442xf32>, vector<4x42xf32> -> vector<4x484xf32>
    %108 = vector.extract_strided_slice %2 {offsets = [0, 15], sizes = [4, 1], strides = [1, 1]} : vector<4x27xf32> to vector<4x1xf32>
    %109 = vector.broadcast %108 : vector<4x1xf32> to vector<4x484xf32>
    %110 = arith.mulf %107, %109 : vector<4x484xf32>
    %111 = arith.addf %104, %110 : vector<4x484xf32>
    %112 = vector.extract_strided_slice %1 {offsets = [0, 44], sizes = [4, 440], strides = [1, 1]} : vector<4x484xf32> to vector<4x440xf32>
    %113 = vector.extract_strided_slice %1 {offsets = [0, 0], sizes = [4, 44], strides = [1, 1]} : vector<4x484xf32> to vector<4x44xf32>
    %114 = tpu.concatenate %112, %113 in 1 : vector<4x440xf32>, vector<4x44xf32> -> vector<4x484xf32>
    %115 = vector.extract_strided_slice %2 {offsets = [0, 16], sizes = [4, 1], strides = [1, 1]} : vector<4x27xf32> to vector<4x1xf32>
    %116 = vector.broadcast %115 : vector<4x1xf32> to vector<4x484xf32>
    %117 = arith.mulf %114, %116 : vector<4x484xf32>
    %118 = arith.addf %111, %117 : vector<4x484xf32>
    %119 = vector.extract_strided_slice %1 {offsets = [0, 46], sizes = [4, 438], strides = [1, 1]} : vector<4x484xf32> to vector<4x438xf32>
    %120 = vector.extract_strided_slice %1 {offsets = [0, 0], sizes = [4, 46], strides = [1, 1]} : vector<4x484xf32> to vector<4x46xf32>
    %121 = tpu.concatenate %119, %120 in 1 : vector<4x438xf32>, vector<4x46xf32> -> vector<4x484xf32>
    %122 = vector.extract_strided_slice %2 {offsets = [0, 17], sizes = [4, 1], strides = [1, 1]} : vector<4x27xf32> to vector<4x1xf32>
    %123 = vector.broadcast %122 : vector<4x1xf32> to vector<4x484xf32>
    %124 = arith.mulf %121, %123 : vector<4x484xf32>
    %125 = arith.addf %118, %124 : vector<4x484xf32>
    %cst_7 = arith.constant 0.000000e+00 : f32
    %126 = vector.broadcast %cst_7 : f32 to vector<4x484xf32>
    %127 = vector.extract_strided_slice %1 {offsets = [0, 415], sizes = [4, 69], strides = [1, 1]} : vector<4x484xf32> to vector<4x69xf32>
    %128 = vector.extract_strided_slice %1 {offsets = [0, 0], sizes = [4, 415], strides = [1, 1]} : vector<4x484xf32> to vector<4x415xf32>
    %129 = tpu.concatenate %127, %128 in 1 : vector<4x69xf32>, vector<4x415xf32> -> vector<4x484xf32>
    %130 = vector.extract_strided_slice %2 {offsets = [0, 18], sizes = [4, 1], strides = [1, 1]} : vector<4x27xf32> to vector<4x1xf32>
    %131 = vector.broadcast %130 : vector<4x1xf32> to vector<4x484xf32>
    %132 = arith.mulf %129, %131 : vector<4x484xf32>
    %133 = arith.addf %126, %132 : vector<4x484xf32>
    %134 = vector.extract_strided_slice %1 {offsets = [0, 418], sizes = [4, 66], strides = [1, 1]} : vector<4x484xf32> to vector<4x66xf32>
    %135 = vector.extract_strided_slice %1 {offsets = [0, 0], sizes = [4, 418], strides = [1, 1]} : vector<4x484xf32> to vector<4x418xf32>
    %136 = tpu.concatenate %134, %135 in 1 : vector<4x66xf32>, vector<4x418xf32> -> vector<4x484xf32>
    %137 = vector.extract_strided_slice %2 {offsets = [0, 19], sizes = [4, 1], strides = [1, 1]} : vector<4x27xf32> to vector<4x1xf32>
    %138 = vector.broadcast %137 : vector<4x1xf32> to vector<4x484xf32>
    %139 = arith.mulf %136, %138 : vector<4x484xf32>
    %140 = arith.addf %133, %139 : vector<4x484xf32>
    %141 = vector.extract_strided_slice %1 {offsets = [0, 421], sizes = [4, 63], strides = [1, 1]} : vector<4x484xf32> to vector<4x63xf32>
    %142 = vector.extract_strided_slice %1 {offsets = [0, 0], sizes = [4, 421], strides = [1, 1]} : vector<4x484xf32> to vector<4x421xf32>
    %143 = tpu.concatenate %141, %142 in 1 : vector<4x63xf32>, vector<4x421xf32> -> vector<4x484xf32>
    %144 = vector.extract_strided_slice %2 {offsets = [0, 20], sizes = [4, 1], strides = [1, 1]} : vector<4x27xf32> to vector<4x1xf32>
    %145 = vector.broadcast %144 : vector<4x1xf32> to vector<4x484xf32>
    %146 = arith.mulf %143, %145 : vector<4x484xf32>
    %147 = arith.addf %140, %146 : vector<4x484xf32>
    %148 = vector.extract_strided_slice %1 {offsets = [0, 481], sizes = [4, 3], strides = [1, 1]} : vector<4x484xf32> to vector<4x3xf32>
    %149 = vector.extract_strided_slice %1 {offsets = [0, 0], sizes = [4, 481], strides = [1, 1]} : vector<4x484xf32> to vector<4x481xf32>
    %150 = tpu.concatenate %148, %149 in 1 : vector<4x3xf32>, vector<4x481xf32> -> vector<4x484xf32>
    %151 = vector.extract_strided_slice %2 {offsets = [0, 21], sizes = [4, 1], strides = [1, 1]} : vector<4x27xf32> to vector<4x1xf32>
    %152 = vector.broadcast %151 : vector<4x1xf32> to vector<4x484xf32>
    %153 = arith.mulf %150, %152 : vector<4x484xf32>
    %154 = arith.addf %147, %153 : vector<4x484xf32>
    %155 = vector.extract_strided_slice %2 {offsets = [0, 22], sizes = [4, 1], strides = [1, 1]} : vector<4x27xf32> to vector<4x1xf32>
    %156 = vector.broadcast %155 : vector<4x1xf32> to vector<4x484xf32>
    %157 = arith.mulf %1, %156 : vector<4x484xf32>
    %158 = arith.addf %154, %157 : vector<4x484xf32>
    %159 = vector.extract_strided_slice %1 {offsets = [0, 3], sizes = [4, 481], strides = [1, 1]} : vector<4x484xf32> to vector<4x481xf32>
    %160 = vector.extract_strided_slice %1 {offsets = [0, 0], sizes = [4, 3], strides = [1, 1]} : vector<4x484xf32> to vector<4x3xf32>
    %161 = tpu.concatenate %159, %160 in 1 : vector<4x481xf32>, vector<4x3xf32> -> vector<4x484xf32>
    %162 = vector.extract_strided_slice %2 {offsets = [0, 23], sizes = [4, 1], strides = [1, 1]} : vector<4x27xf32> to vector<4x1xf32>
    %163 = vector.broadcast %162 : vector<4x1xf32> to vector<4x484xf32>
    %164 = arith.mulf %161, %163 : vector<4x484xf32>
    %165 = arith.addf %158, %164 : vector<4x484xf32>
    %166 = vector.extract_strided_slice %1 {offsets = [0, 63], sizes = [4, 421], strides = [1, 1]} : vector<4x484xf32> to vector<4x421xf32>
    %167 = vector.extract_strided_slice %1 {offsets = [0, 0], sizes = [4, 63], strides = [1, 1]} : vector<4x484xf32> to vector<4x63xf32>
    %168 = tpu.concatenate %166, %167 in 1 : vector<4x421xf32>, vector<4x63xf32> -> vector<4x484xf32>
    %169 = vector.extract_strided_slice %2 {offsets = [0, 24], sizes = [4, 1], strides = [1, 1]} : vector<4x27xf32> to vector<4x1xf32>
    %170 = vector.broadcast %169 : vector<4x1xf32> to vector<4x484xf32>
    %171 = arith.mulf %168, %170 : vector<4x484xf32>
    %172 = arith.addf %165, %171 : vector<4x484xf32>
    %173 = vector.extract_strided_slice %1 {offsets = [0, 66], sizes = [4, 418], strides = [1, 1]} : vector<4x484xf32> to vector<4x418xf32>
    %174 = vector.extract_strided_slice %1 {offsets = [0, 0], sizes = [4, 66], strides = [1, 1]} : vector<4x484xf32> to vector<4x66xf32>
    %175 = tpu.concatenate %173, %174 in 1 : vector<4x418xf32>, vector<4x66xf32> -> vector<4x484xf32>
    %176 = vector.extract_strided_slice %2 {offsets = [0, 25], sizes = [4, 1], strides = [1, 1]} : vector<4x27xf32> to vector<4x1xf32>
    %177 = vector.broadcast %176 : vector<4x1xf32> to vector<4x484xf32>
    %178 = arith.mulf %175, %177 : vector<4x484xf32>
    %179 = arith.addf %172, %178 : vector<4x484xf32>
    %180 = vector.extract_strided_slice %1 {offsets = [0, 69], sizes = [4, 415], strides = [1, 1]} : vector<4x484xf32> to vector<4x415xf32>
    %181 = vector.extract_strided_slice %1 {offsets = [0, 0], sizes = [4, 69], strides = [1, 1]} : vector<4x484xf32> to vector<4x69xf32>
    %182 = tpu.concatenate %180, %181 in 1 : vector<4x415xf32>, vector<4x69xf32> -> vector<4x484xf32>
    %183 = vector.extract_strided_slice %2 {offsets = [0, 26], sizes = [4, 1], strides = [1, 1]} : vector<4x27xf32> to vector<4x1xf32>
    %184 = vector.broadcast %183 : vector<4x1xf32> to vector<4x484xf32>
    %185 = arith.mulf %182, %184 : vector<4x484xf32>
    %186 = arith.addf %179, %185 : vector<4x484xf32>
    %cst_8 = arith.constant 0.000000e+00 : f32
    %187 = vector.broadcast %cst_8 : f32 to vector<4x484xf32>
    %188 = vector.extract_strided_slice %64 {offsets = [0, 0], sizes = [1, 484], strides = [1, 1]} : vector<4x484xf32> to vector<1x484xf32>
    %189 = vector.extract_strided_slice %3 {offsets = [0, 0], sizes = [4, 1], strides = [1, 1]} : vector<4x12xf32> to vector<4x1xf32>
    %190 = vector.broadcast %188 : vector<1x484xf32> to vector<4x484xf32>
    %191 = vector.broadcast %189 : vector<4x1xf32> to vector<4x484xf32>
    %192 = arith.mulf %190, %191 : vector<4x484xf32>
    %193 = arith.addf %187, %192 : vector<4x484xf32>
    %194 = vector.extract_strided_slice %64 {offsets = [1, 0], sizes = [1, 484], strides = [1, 1]} : vector<4x484xf32> to vector<1x484xf32>
    %195 = vector.extract_strided_slice %3 {offsets = [0, 1], sizes = [4, 1], strides = [1, 1]} : vector<4x12xf32> to vector<4x1xf32>
    %196 = vector.broadcast %194 : vector<1x484xf32> to vector<4x484xf32>
    %197 = vector.broadcast %195 : vector<4x1xf32> to vector<4x484xf32>
    %198 = arith.mulf %196, %197 : vector<4x484xf32>
    %199 = arith.addf %193, %198 : vector<4x484xf32>
    %200 = vector.extract_strided_slice %64 {offsets = [2, 0], sizes = [1, 484], strides = [1, 1]} : vector<4x484xf32> to vector<1x484xf32>
    %201 = vector.extract_strided_slice %3 {offsets = [0, 2], sizes = [4, 1], strides = [1, 1]} : vector<4x12xf32> to vector<4x1xf32>
    %202 = vector.broadcast %200 : vector<1x484xf32> to vector<4x484xf32>
    %203 = vector.broadcast %201 : vector<4x1xf32> to vector<4x484xf32>
    %204 = arith.mulf %202, %203 : vector<4x484xf32>
    %205 = arith.addf %199, %204 : vector<4x484xf32>
    %206 = vector.extract_strided_slice %64 {offsets = [3, 0], sizes = [1, 484], strides = [1, 1]} : vector<4x484xf32> to vector<1x484xf32>
    %207 = vector.extract_strided_slice %3 {offsets = [0, 3], sizes = [4, 1], strides = [1, 1]} : vector<4x12xf32> to vector<4x1xf32>
    %208 = vector.broadcast %206 : vector<1x484xf32> to vector<4x484xf32>
    %209 = vector.broadcast %207 : vector<4x1xf32> to vector<4x484xf32>
    %210 = arith.mulf %208, %209 : vector<4x484xf32>
    %211 = arith.addf %205, %210 : vector<4x484xf32>
    %212 = vector.extract_strided_slice %125 {offsets = [0, 0], sizes = [1, 484], strides = [1, 1]} : vector<4x484xf32> to vector<1x484xf32>
    %213 = vector.extract_strided_slice %3 {offsets = [0, 4], sizes = [4, 1], strides = [1, 1]} : vector<4x12xf32> to vector<4x1xf32>
    %214 = vector.broadcast %212 : vector<1x484xf32> to vector<4x484xf32>
    %215 = vector.broadcast %213 : vector<4x1xf32> to vector<4x484xf32>
    %216 = arith.mulf %214, %215 : vector<4x484xf32>
    %217 = arith.addf %211, %216 : vector<4x484xf32>
    %218 = vector.extract_strided_slice %125 {offsets = [1, 0], sizes = [1, 484], strides = [1, 1]} : vector<4x484xf32> to vector<1x484xf32>
    %219 = vector.extract_strided_slice %3 {offsets = [0, 5], sizes = [4, 1], strides = [1, 1]} : vector<4x12xf32> to vector<4x1xf32>
    %220 = vector.broadcast %218 : vector<1x484xf32> to vector<4x484xf32>
    %221 = vector.broadcast %219 : vector<4x1xf32> to vector<4x484xf32>
    %222 = arith.mulf %220, %221 : vector<4x484xf32>
    %223 = arith.addf %217, %222 : vector<4x484xf32>
    %224 = vector.extract_strided_slice %125 {offsets = [2, 0], sizes = [1, 484], strides = [1, 1]} : vector<4x484xf32> to vector<1x484xf32>
    %225 = vector.extract_strided_slice %3 {offsets = [0, 6], sizes = [4, 1], strides = [1, 1]} : vector<4x12xf32> to vector<4x1xf32>
    %226 = vector.broadcast %224 : vector<1x484xf32> to vector<4x484xf32>
    %227 = vector.broadcast %225 : vector<4x1xf32> to vector<4x484xf32>
    %228 = arith.mulf %226, %227 : vector<4x484xf32>
    %229 = arith.addf %223, %228 : vector<4x484xf32>
    %230 = vector.extract_strided_slice %125 {offsets = [3, 0], sizes = [1, 484], strides = [1, 1]} : vector<4x484xf32> to vector<1x484xf32>
    %231 = vector.extract_strided_slice %3 {offsets = [0, 7], sizes = [4, 1], strides = [1, 1]} : vector<4x12xf32> to vector<4x1xf32>
    %232 = vector.broadcast %230 : vector<1x484xf32> to vector<4x484xf32>
    %233 = vector.broadcast %231 : vector<4x1xf32> to vector<4x484xf32>
    %234 = arith.mulf %232, %233 : vector<4x484xf32>
    %235 = arith.addf %229, %234 : vector<4x484xf32>
    %236 = vector.extract_strided_slice %186 {offsets = [0, 0], sizes = [1, 484], strides = [1, 1]} : vector<4x484xf32> to vector<1x484xf32>
    %237 = vector.extract_strided_slice %3 {offsets = [0, 8], sizes = [4, 1], strides = [1, 1]} : vector<4x12xf32> to vector<4x1xf32>
    %238 = vector.broadcast %236 : vector<1x484xf32> to vector<4x484xf32>
    %239 = vector.broadcast %237 : vector<4x1xf32> to vector<4x484xf32>
    %240 = arith.mulf %238, %239 : vector<4x484xf32>
    %241 = arith.addf %235, %240 : vector<4x484xf32>
    %242 = vector.extract_strided_slice %186 {offsets = [1, 0], sizes = [1, 484], strides = [1, 1]} : vector<4x484xf32> to vector<1x484xf32>
    %243 = vector.extract_strided_slice %3 {offsets = [0, 9], sizes = [4, 1], strides = [1, 1]} : vector<4x12xf32> to vector<4x1xf32>
    %244 = vector.broadcast %242 : vector<1x484xf32> to vector<4x484xf32>
    %245 = vector.broadcast %243 : vector<4x1xf32> to vector<4x484xf32>
    %246 = arith.mulf %244, %245 : vector<4x484xf32>
    %247 = arith.addf %241, %246 : vector<4x484xf32>
    %248 = vector.extract_strided_slice %186 {offsets = [2, 0], sizes = [1, 484], strides = [1, 1]} : vector<4x484xf32> to vector<1x484xf32>
    %249 = vector.extract_strided_slice %3 {offsets = [0, 10], sizes = [4, 1], strides = [1, 1]} : vector<4x12xf32> to vector<4x1xf32>
    %250 = vector.broadcast %248 : vector<1x484xf32> to vector<4x484xf32>
    %251 = vector.broadcast %249 : vector<4x1xf32> to vector<4x484xf32>
    %252 = arith.mulf %250, %251 : vector<4x484xf32>
    %253 = arith.addf %247, %252 : vector<4x484xf32>
    %254 = vector.extract_strided_slice %186 {offsets = [3, 0], sizes = [1, 484], strides = [1, 1]} : vector<4x484xf32> to vector<1x484xf32>
    %255 = vector.extract_strided_slice %3 {offsets = [0, 11], sizes = [4, 1], strides = [1, 1]} : vector<4x12xf32> to vector<4x1xf32>
    %256 = vector.broadcast %254 : vector<1x484xf32> to vector<4x484xf32>
    %257 = vector.broadcast %255 : vector<4x1xf32> to vector<4x484xf32>
    %258 = arith.mulf %256, %257 : vector<4x484xf32>
    %259 = arith.addf %253, %258 : vector<4x484xf32>
    %cst_9 = arith.constant 0.000000e+00 : f32
    %260 = vector.broadcast %cst_9 : f32 to vector<4x1xf32>
    %cst_10 = arith.constant 0.000000e+00 : f32
    %261 = vector.broadcast %cst_10 : f32 to vector<4x1xf32>
    %262 = vector.extract_strided_slice %259 {offsets = [0, 69], sizes = [4, 16], strides = [1, 1]} : vector<4x484xf32> to vector<4x16xf32>
    %c0_11 = arith.constant 0 : index
    %c0_12 = arith.constant 0 : index
    %c0_13 = arith.constant 0 : index
    %263 = vector.load %arg4[%c0_11, %c0_12, %c0_13] : memref<1x4x256xf32, #tpu.memory_space<vmem>>, vector<1x4x16xf32>
    %264 = vector.shape_cast %263 : vector<1x4x16xf32> to vector<4x16xf32>
    %265 = vector.shape_cast %262 : vector<4x16xf32> to vector<1x4x16xf32>
    tpu.vector_store %arg4[%c0_11, %c0_12, %c0_13], %265 {strides = array<i32>} : memref<1x4x256xf32, #tpu.memory_space<vmem>>, vector<1x4x16xf32>,
    %cst_14 = arith.constant dense<0.000000e+00> : vector<4xf32>
    %266 = vector.multi_reduction <add>, %262, %cst_14 [1] : vector<4x16xf32> to vector<4xf32>
    %267 = vector.shape_cast %266 : vector<4xf32> to vector<4x1xf32>
    %268 = arith.addf %260, %267 : vector<4x1xf32>
    %269 = arith.mulf %262, %262 : vector<4x16xf32>
    %cst_15 = arith.constant dense<0.000000e+00> : vector<4xf32>
    %270 = vector.multi_reduction <add>, %269, %cst_15 [1] : vector<4x16xf32> to vector<4xf32>
    %271 = vector.shape_cast %270 : vector<4xf32> to vector<4x1xf32>
    %272 = arith.addf %261, %271 : vector<4x1xf32>
    %273 = vector.extract_strided_slice %259 {offsets = [0, 91], sizes = [4, 16], strides = [1, 1]} : vector<4x484xf32> to vector<4x16xf32>
    %c0_16 = arith.constant 0 : index
    %c0_17 = arith.constant 0 : index
    %c16 = arith.constant 16 : index
    %274 = vector.load %arg4[%c0_16, %c0_17, %c16] : memref<1x4x256xf32, #tpu.memory_space<vmem>>, vector<1x4x16xf32>
    %275 = vector.shape_cast %274 : vector<1x4x16xf32> to vector<4x16xf32>
    %276 = vector.shape_cast %273 : vector<4x16xf32> to vector<1x4x16xf32>
    tpu.vector_store %arg4[%c0_16, %c0_17, %c16], %276 {strides = array<i32>} : memref<1x4x256xf32, #tpu.memory_space<vmem>>, vector<1x4x16xf32>,
    %cst_18 = arith.constant dense<0.000000e+00> : vector<4xf32>
    %277 = vector.multi_reduction <add>, %273, %cst_18 [1] : vector<4x16xf32> to vector<4xf32>
    %278 = vector.shape_cast %277 : vector<4xf32> to vector<4x1xf32>
    %279 = arith.addf %268, %278 : vector<4x1xf32>
    %280 = arith.mulf %273, %273 : vector<4x16xf32>
    %cst_19 = arith.constant dense<0.000000e+00> : vector<4xf32>
    %281 = vector.multi_reduction <add>, %280, %cst_19 [1] : vector<4x16xf32> to vector<4xf32>
    %282 = vector.shape_cast %281 : vector<4xf32> to vector<4x1xf32>
    %283 = arith.addf %272, %282 : vector<4x1xf32>
    %284 = vector.extract_strided_slice %259 {offsets = [0, 113], sizes = [4, 16], strides = [1, 1]} : vector<4x484xf32> to vector<4x16xf32>
    %c0_20 = arith.constant 0 : index
    %c0_21 = arith.constant 0 : index
    %c32 = arith.constant 32 : index
    %285 = vector.load %arg4[%c0_20, %c0_21, %c32] : memref<1x4x256xf32, #tpu.memory_space<vmem>>, vector<1x4x16xf32>
    %286 = vector.shape_cast %285 : vector<1x4x16xf32> to vector<4x16xf32>
    %287 = vector.shape_cast %284 : vector<4x16xf32> to vector<1x4x16xf32>
    tpu.vector_store %arg4[%c0_20, %c0_21, %c32], %287 {strides = array<i32>} : memref<1x4x256xf32, #tpu.memory_space<vmem>>, vector<1x4x16xf32>,
    %cst_22 = arith.constant dense<0.000000e+00> : vector<4xf32>
    %288 = vector.multi_reduction <add>, %284, %cst_22 [1] : vector<4x16xf32> to vector<4xf32>
    %289 = vector.shape_cast %288 : vector<4xf32> to vector<4x1xf32>
    %290 = arith.addf %279, %289 : vector<4x1xf32>
    %291 = arith.mulf %284, %284 : vector<4x16xf32>
    %cst_23 = arith.constant dense<0.000000e+00> : vector<4xf32>
    %292 = vector.multi_reduction <add>, %291, %cst_23 [1] : vector<4x16xf32> to vector<4xf32>
    %293 = vector.shape_cast %292 : vector<4xf32> to vector<4x1xf32>
    %294 = arith.addf %283, %293 : vector<4x1xf32>
    %295 = vector.extract_strided_slice %259 {offsets = [0, 135], sizes = [4, 16], strides = [1, 1]} : vector<4x484xf32> to vector<4x16xf32>
    %c0_24 = arith.constant 0 : index
    %c0_25 = arith.constant 0 : index
    %c48 = arith.constant 48 : index
    %296 = vector.load %arg4[%c0_24, %c0_25, %c48] : memref<1x4x256xf32, #tpu.memory_space<vmem>>, vector<1x4x16xf32>
    %297 = vector.shape_cast %296 : vector<1x4x16xf32> to vector<4x16xf32>
    %298 = vector.shape_cast %295 : vector<4x16xf32> to vector<1x4x16xf32>
    tpu.vector_store %arg4[%c0_24, %c0_25, %c48], %298 {strides = array<i32>} : memref<1x4x256xf32, #tpu.memory_space<vmem>>, vector<1x4x16xf32>,
    %cst_26 = arith.constant dense<0.000000e+00> : vector<4xf32>
    %299 = vector.multi_reduction <add>, %295, %cst_26 [1] : vector<4x16xf32> to vector<4xf32>
    %300 = vector.shape_cast %299 : vector<4xf32> to vector<4x1xf32>
    %301 = arith.addf %290, %300 : vector<4x1xf32>
    %302 = arith.mulf %295, %295 : vector<4x16xf32>
    %cst_27 = arith.constant dense<0.000000e+00> : vector<4xf32>
    %303 = vector.multi_reduction <add>, %302, %cst_27 [1] : vector<4x16xf32> to vector<4xf32>
    %304 = vector.shape_cast %303 : vector<4xf32> to vector<4x1xf32>
    %305 = arith.addf %294, %304 : vector<4x1xf32>
    %306 = vector.extract_strided_slice %259 {offsets = [0, 157], sizes = [4, 16], strides = [1, 1]} : vector<4x484xf32> to vector<4x16xf32>
    %c0_28 = arith.constant 0 : index
    %c0_29 = arith.constant 0 : index
    %c64 = arith.constant 64 : index
    %307 = vector.load %arg4[%c0_28, %c0_29, %c64] : memref<1x4x256xf32, #tpu.memory_space<vmem>>, vector<1x4x16xf32>
    %308 = vector.shape_cast %307 : vector<1x4x16xf32> to vector<4x16xf32>
    %309 = vector.shape_cast %306 : vector<4x16xf32> to vector<1x4x16xf32>
    tpu.vector_store %arg4[%c0_28, %c0_29, %c64], %309 {strides = array<i32>} : memref<1x4x256xf32, #tpu.memory_space<vmem>>, vector<1x4x16xf32>,
    %cst_30 = arith.constant dense<0.000000e+00> : vector<4xf32>
    %310 = vector.multi_reduction <add>, %306, %cst_30 [1] : vector<4x16xf32> to vector<4xf32>
    %311 = vector.shape_cast %310 : vector<4xf32> to vector<4x1xf32>
    %312 = arith.addf %301, %311 : vector<4x1xf32>
    %313 = arith.mulf %306, %306 : vector<4x16xf32>
    %cst_31 = arith.constant dense<0.000000e+00> : vector<4xf32>
    %314 = vector.multi_reduction <add>, %313, %cst_31 [1] : vector<4x16xf32> to vector<4xf32>
    %315 = vector.shape_cast %314 : vector<4xf32> to vector<4x1xf32>
    %316 = arith.addf %305, %315 : vector<4x1xf32>
    %317 = vector.extract_strided_slice %259 {offsets = [0, 179], sizes = [4, 16], strides = [1, 1]} : vector<4x484xf32> to vector<4x16xf32>
    %c0_32 = arith.constant 0 : index
    %c0_33 = arith.constant 0 : index
    %c80 = arith.constant 80 : index
    %318 = vector.load %arg4[%c0_32, %c0_33, %c80] : memref<1x4x256xf32, #tpu.memory_space<vmem>>, vector<1x4x16xf32>
    %319 = vector.shape_cast %318 : vector<1x4x16xf32> to vector<4x16xf32>
    %320 = vector.shape_cast %317 : vector<4x16xf32> to vector<1x4x16xf32>
    tpu.vector_store %arg4[%c0_32, %c0_33, %c80], %320 {strides = array<i32>} : memref<1x4x256xf32, #tpu.memory_space<vmem>>, vector<1x4x16xf32>,
    %cst_34 = arith.constant dense<0.000000e+00> : vector<4xf32>
    %321 = vector.multi_reduction <add>, %317, %cst_34 [1] : vector<4x16xf32> to vector<4xf32>
    %322 = vector.shape_cast %321 : vector<4xf32> to vector<4x1xf32>
    %323 = arith.addf %312, %322 : vector<4x1xf32>
    %324 = arith.mulf %317, %317 : vector<4x16xf32>
    %cst_35 = arith.constant dense<0.000000e+00> : vector<4xf32>
    %325 = vector.multi_reduction <add>, %324, %cst_35 [1] : vector<4x16xf32> to vector<4xf32>
    %326 = vector.shape_cast %325 : vector<4xf32> to vector<4x1xf32>
    %327 = arith.addf %316, %326 : vector<4x1xf32>
    %328 = vector.extract_strided_slice %259 {offsets = [0, 201], sizes = [4, 16], strides = [1, 1]} : vector<4x484xf32> to vector<4x16xf32>
    %c0_36 = arith.constant 0 : index
    %c0_37 = arith.constant 0 : index
    %c96 = arith.constant 96 : index
    %329 = vector.load %arg4[%c0_36, %c0_37, %c96] : memref<1x4x256xf32, #tpu.memory_space<vmem>>, vector<1x4x16xf32>
    %330 = vector.shape_cast %329 : vector<1x4x16xf32> to vector<4x16xf32>
    %331 = vector.shape_cast %328 : vector<4x16xf32> to vector<1x4x16xf32>
    tpu.vector_store %arg4[%c0_36, %c0_37, %c96], %331 {strides = array<i32>} : memref<1x4x256xf32, #tpu.memory_space<vmem>>, vector<1x4x16xf32>,
    %cst_38 = arith.constant dense<0.000000e+00> : vector<4xf32>
    %332 = vector.multi_reduction <add>, %328, %cst_38 [1] : vector<4x16xf32> to vector<4xf32>
    %333 = vector.shape_cast %332 : vector<4xf32> to vector<4x1xf32>
    %334 = arith.addf %323, %333 : vector<4x1xf32>
    %335 = arith.mulf %328, %328 : vector<4x16xf32>
    %cst_39 = arith.constant dense<0.000000e+00> : vector<4xf32>
    %336 = vector.multi_reduction <add>, %335, %cst_39 [1] : vector<4x16xf32> to vector<4xf32>
    %337 = vector.shape_cast %336 : vector<4xf32> to vector<4x1xf32>
    %338 = arith.addf %327, %337 : vector<4x1xf32>
    %339 = vector.extract_strided_slice %259 {offsets = [0, 223], sizes = [4, 16], strides = [1, 1]} : vector<4x484xf32> to vector<4x16xf32>
    %c0_40 = arith.constant 0 : index
    %c0_41 = arith.constant 0 : index
    %c112 = arith.constant 112 : index
    %340 = vector.load %arg4[%c0_40, %c0_41, %c112] : memref<1x4x256xf32, #tpu.memory_space<vmem>>, vector<1x4x16xf32>
    %341 = vector.shape_cast %340 : vector<1x4x16xf32> to vector<4x16xf32>
    %342 = vector.shape_cast %339 : vector<4x16xf32> to vector<1x4x16xf32>
    tpu.vector_store %arg4[%c0_40, %c0_41, %c112], %342 {strides = array<i32>} : memref<1x4x256xf32, #tpu.memory_space<vmem>>, vector<1x4x16xf32>,
    %cst_42 = arith.constant dense<0.000000e+00> : vector<4xf32>
    %343 = vector.multi_reduction <add>, %339, %cst_42 [1] : vector<4x16xf32> to vector<4xf32>
    %344 = vector.shape_cast %343 : vector<4xf32> to vector<4x1xf32>
    %345 = arith.addf %334, %344 : vector<4x1xf32>
    %346 = arith.mulf %339, %339 : vector<4x16xf32>
    %cst_43 = arith.constant dense<0.000000e+00> : vector<4xf32>
    %347 = vector.multi_reduction <add>, %346, %cst_43 [1] : vector<4x16xf32> to vector<4xf32>
    %348 = vector.shape_cast %347 : vector<4xf32> to vector<4x1xf32>
    %349 = arith.addf %338, %348 : vector<4x1xf32>
    %350 = vector.extract_strided_slice %259 {offsets = [0, 245], sizes = [4, 16], strides = [1, 1]} : vector<4x484xf32> to vector<4x16xf32>
    %c0_44 = arith.constant 0 : index
    %c0_45 = arith.constant 0 : index
    %c128 = arith.constant 128 : index
    %351 = vector.load %arg4[%c0_44, %c0_45, %c128] : memref<1x4x256xf32, #tpu.memory_space<vmem>>, vector<1x4x16xf32>
    %352 = vector.shape_cast %351 : vector<1x4x16xf32> to vector<4x16xf32>
    %353 = vector.shape_cast %350 : vector<4x16xf32> to vector<1x4x16xf32>
    tpu.vector_store %arg4[%c0_44, %c0_45, %c128], %353 {strides = array<i32>} : memref<1x4x256xf32, #tpu.memory_space<vmem>>, vector<1x4x16xf32>,
    %cst_46 = arith.constant dense<0.000000e+00> : vector<4xf32>
    %354 = vector.multi_reduction <add>, %350, %cst_46 [1] : vector<4x16xf32> to vector<4xf32>
    %355 = vector.shape_cast %354 : vector<4xf32> to vector<4x1xf32>
    %356 = arith.addf %345, %355 : vector<4x1xf32>
    %357 = arith.mulf %350, %350 : vector<4x16xf32>
    %cst_47 = arith.constant dense<0.000000e+00> : vector<4xf32>
    %358 = vector.multi_reduction <add>, %357, %cst_47 [1] : vector<4x16xf32> to vector<4xf32>
    %359 = vector.shape_cast %358 : vector<4xf32> to vector<4x1xf32>
    %360 = arith.addf %349, %359 : vector<4x1xf32>
    %361 = vector.extract_strided_slice %259 {offsets = [0, 267], sizes = [4, 16], strides = [1, 1]} : vector<4x484xf32> to vector<4x16xf32>
    %c0_48 = arith.constant 0 : index
    %c0_49 = arith.constant 0 : index
    %c144 = arith.constant 144 : index
    %362 = vector.load %arg4[%c0_48, %c0_49, %c144] : memref<1x4x256xf32, #tpu.memory_space<vmem>>, vector<1x4x16xf32>
    %363 = vector.shape_cast %362 : vector<1x4x16xf32> to vector<4x16xf32>
    %364 = vector.shape_cast %361 : vector<4x16xf32> to vector<1x4x16xf32>
    tpu.vector_store %arg4[%c0_48, %c0_49, %c144], %364 {strides = array<i32>} : memref<1x4x256xf32, #tpu.memory_space<vmem>>, vector<1x4x16xf32>,
    %cst_50 = arith.constant dense<0.000000e+00> : vector<4xf32>
    %365 = vector.multi_reduction <add>, %361, %cst_50 [1] : vector<4x16xf32> to vector<4xf32>
    %366 = vector.shape_cast %365 : vector<4xf32> to vector<4x1xf32>
    %367 = arith.addf %356, %366 : vector<4x1xf32>
    %368 = arith.mulf %361, %361 : vector<4x16xf32>
    %cst_51 = arith.constant dense<0.000000e+00> : vector<4xf32>
    %369 = vector.multi_reduction <add>, %368, %cst_51 [1] : vector<4x16xf32> to vector<4xf32>
    %370 = vector.shape_cast %369 : vector<4xf32> to vector<4x1xf32>
    %371 = arith.addf %360, %370 : vector<4x1xf32>
    %372 = vector.extract_strided_slice %259 {offsets = [0, 289], sizes = [4, 16], strides = [1, 1]} : vector<4x484xf32> to vector<4x16xf32>
    %c0_52 = arith.constant 0 : index
    %c0_53 = arith.constant 0 : index
    %c160 = arith.constant 160 : index
    %373 = vector.load %arg4[%c0_52, %c0_53, %c160] : memref<1x4x256xf32, #tpu.memory_space<vmem>>, vector<1x4x16xf32>
    %374 = vector.shape_cast %373 : vector<1x4x16xf32> to vector<4x16xf32>
    %375 = vector.shape_cast %372 : vector<4x16xf32> to vector<1x4x16xf32>
    tpu.vector_store %arg4[%c0_52, %c0_53, %c160], %375 {strides = array<i32>} : memref<1x4x256xf32, #tpu.memory_space<vmem>>, vector<1x4x16xf32>,
    %cst_54 = arith.constant dense<0.000000e+00> : vector<4xf32>
    %376 = vector.multi_reduction <add>, %372, %cst_54 [1] : vector<4x16xf32> to vector<4xf32>
    %377 = vector.shape_cast %376 : vector<4xf32> to vector<4x1xf32>
    %378 = arith.addf %367, %377 : vector<4x1xf32>
    %379 = arith.mulf %372, %372 : vector<4x16xf32>
    %cst_55 = arith.constant dense<0.000000e+00> : vector<4xf32>
    %380 = vector.multi_reduction <add>, %379, %cst_55 [1] : vector<4x16xf32> to vector<4xf32>
    %381 = vector.shape_cast %380 : vector<4xf32> to vector<4x1xf32>
    %382 = arith.addf %371, %381 : vector<4x1xf32>
    %383 = vector.extract_strided_slice %259 {offsets = [0, 311], sizes = [4, 16], strides = [1, 1]} : vector<4x484xf32> to vector<4x16xf32>
    %c0_56 = arith.constant 0 : index
    %c0_57 = arith.constant 0 : index
    %c176 = arith.constant 176 : index
    %384 = vector.load %arg4[%c0_56, %c0_57, %c176] : memref<1x4x256xf32, #tpu.memory_space<vmem>>, vector<1x4x16xf32>
    %385 = vector.shape_cast %384 : vector<1x4x16xf32> to vector<4x16xf32>
    %386 = vector.shape_cast %383 : vector<4x16xf32> to vector<1x4x16xf32>
    tpu.vector_store %arg4[%c0_56, %c0_57, %c176], %386 {strides = array<i32>} : memref<1x4x256xf32, #tpu.memory_space<vmem>>, vector<1x4x16xf32>,
    %cst_58 = arith.constant dense<0.000000e+00> : vector<4xf32>
    %387 = vector.multi_reduction <add>, %383, %cst_58 [1] : vector<4x16xf32> to vector<4xf32>
    %388 = vector.shape_cast %387 : vector<4xf32> to vector<4x1xf32>
    %389 = arith.addf %378, %388 : vector<4x1xf32>
    %390 = arith.mulf %383, %383 : vector<4x16xf32>
    %cst_59 = arith.constant dense<0.000000e+00> : vector<4xf32>
    %391 = vector.multi_reduction <add>, %390, %cst_59 [1] : vector<4x16xf32> to vector<4xf32>
    %392 = vector.shape_cast %391 : vector<4xf32> to vector<4x1xf32>
    %393 = arith.addf %382, %392 : vector<4x1xf32>
    %394 = vector.extract_strided_slice %259 {offsets = [0, 333], sizes = [4, 16], strides = [1, 1]} : vector<4x484xf32> to vector<4x16xf32>
    %c0_60 = arith.constant 0 : index
    %c0_61 = arith.constant 0 : index
    %c192 = arith.constant 192 : index
    %395 = vector.load %arg4[%c0_60, %c0_61, %c192] : memref<1x4x256xf32, #tpu.memory_space<vmem>>, vector<1x4x16xf32>
    %396 = vector.shape_cast %395 : vector<1x4x16xf32> to vector<4x16xf32>
    %397 = vector.shape_cast %394 : vector<4x16xf32> to vector<1x4x16xf32>
    tpu.vector_store %arg4[%c0_60, %c0_61, %c192], %397 {strides = array<i32>} : memref<1x4x256xf32, #tpu.memory_space<vmem>>, vector<1x4x16xf32>,
    %cst_62 = arith.constant dense<0.000000e+00> : vector<4xf32>
    %398 = vector.multi_reduction <add>, %394, %cst_62 [1] : vector<4x16xf32> to vector<4xf32>
    %399 = vector.shape_cast %398 : vector<4xf32> to vector<4x1xf32>
    %400 = arith.addf %389, %399 : vector<4x1xf32>
    %401 = arith.mulf %394, %394 : vector<4x16xf32>
    %cst_63 = arith.constant dense<0.000000e+00> : vector<4xf32>
    %402 = vector.multi_reduction <add>, %401, %cst_63 [1] : vector<4x16xf32> to vector<4xf32>
    %403 = vector.shape_cast %402 : vector<4xf32> to vector<4x1xf32>
    %404 = arith.addf %393, %403 : vector<4x1xf32>
    %405 = vector.extract_strided_slice %259 {offsets = [0, 355], sizes = [4, 16], strides = [1, 1]} : vector<4x484xf32> to vector<4x16xf32>
    %c0_64 = arith.constant 0 : index
    %c0_65 = arith.constant 0 : index
    %c208 = arith.constant 208 : index
    %406 = vector.load %arg4[%c0_64, %c0_65, %c208] : memref<1x4x256xf32, #tpu.memory_space<vmem>>, vector<1x4x16xf32>
    %407 = vector.shape_cast %406 : vector<1x4x16xf32> to vector<4x16xf32>
    %408 = vector.shape_cast %405 : vector<4x16xf32> to vector<1x4x16xf32>
    tpu.vector_store %arg4[%c0_64, %c0_65, %c208], %408 {strides = array<i32>} : memref<1x4x256xf32, #tpu.memory_space<vmem>>, vector<1x4x16xf32>,
    %cst_66 = arith.constant dense<0.000000e+00> : vector<4xf32>
    %409 = vector.multi_reduction <add>, %405, %cst_66 [1] : vector<4x16xf32> to vector<4xf32>
    %410 = vector.shape_cast %409 : vector<4xf32> to vector<4x1xf32>
    %411 = arith.addf %400, %410 : vector<4x1xf32>
    %412 = arith.mulf %405, %405 : vector<4x16xf32>
    %cst_67 = arith.constant dense<0.000000e+00> : vector<4xf32>
    %413 = vector.multi_reduction <add>, %412, %cst_67 [1] : vector<4x16xf32> to vector<4xf32>
    %414 = vector.shape_cast %413 : vector<4xf32> to vector<4x1xf32>
    %415 = arith.addf %404, %414 : vector<4x1xf32>
    %416 = vector.extract_strided_slice %259 {offsets = [0, 377], sizes = [4, 16], strides = [1, 1]} : vector<4x484xf32> to vector<4x16xf32>
    %c0_68 = arith.constant 0 : index
    %c0_69 = arith.constant 0 : index
    %c224 = arith.constant 224 : index
    %417 = vector.load %arg4[%c0_68, %c0_69, %c224] : memref<1x4x256xf32, #tpu.memory_space<vmem>>, vector<1x4x16xf32>
    %418 = vector.shape_cast %417 : vector<1x4x16xf32> to vector<4x16xf32>
    %419 = vector.shape_cast %416 : vector<4x16xf32> to vector<1x4x16xf32>
    tpu.vector_store %arg4[%c0_68, %c0_69, %c224], %419 {strides = array<i32>} : memref<1x4x256xf32, #tpu.memory_space<vmem>>, vector<1x4x16xf32>,
    %cst_70 = arith.constant dense<0.000000e+00> : vector<4xf32>
    %420 = vector.multi_reduction <add>, %416, %cst_70 [1] : vector<4x16xf32> to vector<4xf32>
    %421 = vector.shape_cast %420 : vector<4xf32> to vector<4x1xf32>
    %422 = arith.addf %411, %421 : vector<4x1xf32>
    %423 = arith.mulf %416, %416 : vector<4x16xf32>
    %cst_71 = arith.constant dense<0.000000e+00> : vector<4xf32>
    %424 = vector.multi_reduction <add>, %423, %cst_71 [1] : vector<4x16xf32> to vector<4xf32>
    %425 = vector.shape_cast %424 : vector<4xf32> to vector<4x1xf32>
    %426 = arith.addf %415, %425 : vector<4x1xf32>
    %427 = vector.extract_strided_slice %259 {offsets = [0, 399], sizes = [4, 16], strides = [1, 1]} : vector<4x484xf32> to vector<4x16xf32>
    %c0_72 = arith.constant 0 : index
    %c0_73 = arith.constant 0 : index
    %c240 = arith.constant 240 : index
    %428 = vector.load %arg4[%c0_72, %c0_73, %c240] : memref<1x4x256xf32, #tpu.memory_space<vmem>>, vector<1x4x16xf32>
    %429 = vector.shape_cast %428 : vector<1x4x16xf32> to vector<4x16xf32>
    %430 = vector.shape_cast %427 : vector<4x16xf32> to vector<1x4x16xf32>
    tpu.vector_store %arg4[%c0_72, %c0_73, %c240], %430 {strides = array<i32>} : memref<1x4x256xf32, #tpu.memory_space<vmem>>, vector<1x4x16xf32>,
    %cst_74 = arith.constant dense<0.000000e+00> : vector<4xf32>
    %431 = vector.multi_reduction <add>, %427, %cst_74 [1] : vector<4x16xf32> to vector<4xf32>
    %432 = vector.shape_cast %431 : vector<4xf32> to vector<4x1xf32>
    %433 = arith.addf %422, %432 : vector<4x1xf32>
    %434 = arith.mulf %427, %427 : vector<4x16xf32>
    %cst_75 = arith.constant dense<0.000000e+00> : vector<4xf32>
    %435 = vector.multi_reduction <add>, %434, %cst_75 [1] : vector<4x16xf32> to vector<4xf32>
    %436 = vector.shape_cast %435 : vector<4xf32> to vector<4x1xf32>
    %437 = arith.addf %426, %436 : vector<4x1xf32>
    %438 = tpu.concatenate %433, %437 in 1 : vector<4x1xf32>, vector<4x1xf32> -> vector<4x2xf32>
    %c0_76 = arith.constant 0 : index
    %c0_77 = arith.constant 0 : index
    %c0_78 = arith.constant 0 : index
    %439 = vector.load %arg5[%c0_76, %c0_77, %c0_78] : memref<1x4x2xf32, #tpu.memory_space<vmem>>, vector<1x4x2xf32>
    %440 = vector.shape_cast %439 : vector<1x4x2xf32> to vector<4x2xf32>
    %441 = vector.shape_cast %438 : vector<4x2xf32> to vector<1x4x2xf32>
    tpu.vector_store %arg5[%c0_76, %c0_77, %c0_78], %441 {strides = array<i32>} : memref<1x4x2xf32, #tpu.memory_space<vmem>>, vector<1x4x2xf32>,
    return
  }
  func.func @transform_0(%arg0: i32) -> (i32, i32, i32) {
    %c0_i32 = arith.constant 0 : i32
    %c0_i32_0 = arith.constant 0 : i32
    %c0_i32_1 = arith.constant 0 : i32
    return %arg0, %c0_i32, %c0_i32_0 : i32, i32, i32
  }
  func.func @transform_1(%arg0: i32) -> (i32, i32) {
    %c0_i32 = arith.constant 0 : i32
    %c0_i32_0 = arith.constant 0 : i32
    %c0_i32_1 = arith.constant 0 : i32
    return %c0_i32, %c0_i32_0 : i32, i32
  }
  func.func @transform_2(%arg0: i32) -> (i32, i32) {
    %c0_i32 = arith.constant 0 : i32
    %c0_i32_0 = arith.constant 0 : i32
    %c0_i32_1 = arith.constant 0 : i32
    return %c0_i32, %c0_i32_0 : i32, i32
  }
  func.func @transform_3(%arg0: i32) -> (i32, i32, i32) {
    %c0_i32 = arith.constant 0 : i32
    %c0_i32_0 = arith.constant 0 : i32
    %c0_i32_1 = arith.constant 0 : i32
    return %arg0, %c0_i32, %c0_i32_0 : i32, i32, i32
  }
  func.func @transform_4(%arg0: i32) -> (i32, i32, i32) {
    %c0_i32 = arith.constant 0 : i32
    %c0_i32_0 = arith.constant 0 : i32
    %c0_i32_1 = arith.constant 0 : i32
    return %arg0, %c0_i32, %c0_i32_0 : i32, i32, i32
  }
}

</mosaic_0001>

<bundles_post_ra>
// kernel: mck_forward.3
= control target key start
LH: loop header
LB: loop body
LE: loop exit
PB: predicated region body
PF: predicated region fallthrough
CT: control target
= control target key end

     0   :  { %s310_s12 = smov 0   ;;  %s333_s0 = inlined_call_operand.vmem [shape: f32[2,4,256], index: 0, kind: input, shape index: {}]   ;;  %s334_s1 = inlined_call_operand.vmem [shape: f32[4,1], index: 1, kind: input, shape index: {}]   ;;  %s335_s2 = inlined_call_operand.vmem [shape: f32[4,1], index: 2, kind: input, shape index: {}]   ;;  %s336_s3 = inlined_call_operand.vmem [shape: f32[2,4,256], index: 3, kind: output, shape index: {}]  }
   0x1 LB: > { %s256_s13 = sadd.s32 4294967295, %s286_s12   ;;  %p260_p0 = scmp.ge.s32.totalorder %s286_s12, 1  ;;  %s286_s12 = sphi %s310_s12, %s13_s12  }
   0x2   : > { %p137_p1 = scmp.lt.s32.totalorder %s286_s12, 3 }
   0x4   : > { %p138_p2 = pnand %p260_p0, %p137_p1 }
   0x5   : > { %v172_v0 = vld [vmem:[%s334_s1] sm:$0xf] (!%p138_p2)  ;;  %v288_v1 = vmov (!%p138_p2), 0   ;;  %p161_p3 = scmp.lt.s32.totalorder (!%p138_p2), %s256_s13, 1  ;;  %v289_v3 = vmov (!%p138_p2), 839922192   ;;  %v180_v5 = vlaneseq (!%p138_p2) }
   0x6   : > { %141 = sbr.rel (%p138_p2) target bundleno = 144 (0x90), region = 32  ;;  %279 = vset.pattern.permute.xlu0 (!%p138_p2), %v288_v1  ;;  %v186_v2 = vld [vmem:[%s335_s2] sm:$0xf] (!%p138_p2)  ;;  %v178_v4 = vunpack.c.l.s4 (!%p138_p2), %v289_v3 }
   0x7   : > { %175 = vperm.xlu0 (!%p138_p2), %279, %v172_v0   ;;  %v181_v7 = vshrl.u32 (!%p138_p2), %v180_v5, 7 }
   0x8   : > { %v179_v6 = vunpack.c.0.s8 (!%p138_p2), %v178_v4 }
   0xa   : > { %v182_v8 = vsub.s32 (!%p138_p2), %v179_v6, %v181_v7 }
   0xb   : > { %189 = vperm.xlu0 (!%p138_p2), %279, %v186_v2  }
   0xd   : > { %s338_s13 = smov (!%p161_p3, %s256_s13), 1 }
   0xe   : > { %s267_s18 = sshll.u32 %s338_s13, 3 }
   0xf   : > { %s165_s21 = scalar_lea.vmem %s333_s0, %s267_s18  ;;  %s170_s24 = scalar_lea.vmem %s336_s3, %s267_s18 }
  0x10   : > { %v171_v11 = vld [vmem:[%s165_s21] sm:$0xff] }
  0x86   : > { %v176_v9 = vpop.permute.xlu0 %175 }
  0x87   : > { %v183_v10 = vrot.slane %v176_v9, %v182_v8 }
  0x89   : > { %v185_v13 = vmul.f32 %v183_v10, %v171_v11 }
  0x8a   : > { %v190_v12 = vpop.permute.xlu0 %189 }
  0x8b   : > { %v197_v14 = vrot.slane %v190_v12, %v182_v8 }
  0x8d   : > { %v199_v15 = vadd.f32 %v197_v14, %v185_v13 }
  0x8f   : > { %200 = vst [vmem:[%s170_s24] sm:$0xff] %v199_v15 }
  0x90 PF: > { %s13_s12 = sadd.s32 1, %s286_s12  }
  0x91   : > { %p10_p4 = scmp.ge.s32.totalorder %s13_s12, 4  }
  0x93   :  { %12 = sbr.rel (!%p10_p4) target bundleno = 1 (0x1), region = 62 }

// kernel: mck_forward.2
= control target key start
LH: loop header
LB: loop body
LE: loop exit
PB: predicated region body
PF: predicated region fallthrough
CT: control target
= control target key end

     0   :  { %s2115_s15 = smov 0   ;;  %s3240_s0 = inlined_call_operand.vmem [shape: f32[2,4,484], index: 0, kind: input, shape index: {}]   ;;  %s3241_s1 = inlined_call_operand.vmem [shape: f32[4,27], index: 1, kind: input, shape index: {}]   ;;  %s3242_s2 = inlined_call_operand.vmem [shape: f32[4,12], index: 2, kind: input, shape index: {}]   ;;  %s3243_s3 = inlined_call_operand.vmem [shape: f32[2,4,256], index: 3, kind: output, shape index: {0}]   ;;  %s3244_s4 = inlined_call_operand.vmem [shape: f32[2,4,2], index: 4, kind: output, shape index: {1}]  }
   0x1 LB: > { %s1830_s16 = sadd.s32 4294967295, %s1995_s15   ;;  %p1834_p0 = scmp.ge.s32.totalorder %s1995_s15, 1  ;;  %s1995_s15 = sphi %s2115_s15, %s15_s15  }
   0x2   : > { %p165_p1 = scmp.lt.s32.totalorder %s1995_s15, 3 }
   0x4   : > { %p166_p2 = pnand %p1834_p0, %p165_p1 }
   0x6   : > { %169 = sbr.rel (%p166_p2) target bundleno = 2869 (0xb35), region = 32 }
   0xd   : > { %p195_p3 = scmp.lt.s32.totalorder %s1830_s16, 1  ;;  %v1997_v0 = vmov 0   ;;  %v3249_v1 = vmov 4   ;;  %s1999_s21 = smov 23   ;;  %v2150_v5 = vld [vmem:[%s3241_s1] sm:$0xf] }
   0xe   : > { %1945 = vset.pattern.permute.xlu1 %v1997_v0  ;;  %1949 = vset.pattern.permute.xlu0 %v3249_v1  ;;  %s2000_s24 = smov 51   ;;  %v3254_v7 = vmov 1   ;;  %s2002_s25 = smov 50   ;;  %v3252_v8 = vmov 2   ;;  %v3256_v9 = vmov 3   ;;  %v3248_v10 = vmov 5  }
   0xf   : > { %s3404_s16 = smov (!%p195_p3, %s1830_s16), 1  ;;  %s2003_s26 = smov 22   ;;  %v2012_v11 = vmov 13   ;;  %v3255_v12 = vmov 6   ;;  %v3247_v13 = vmov 7   ;;  %v3246_v14 = vmov 8  }
  0x10   : > { %s1842_s17 = sshll.u32 %s3404_s16, 4  ;;  %s2004_s27 = smov 49   ;;  %v3253_v15 = vmov 9   ;;  %v3245_v16 = vmov 10   ;;  %v3250_v20 = vmov 11   ;;  %v2034_v27 = vmov 12  }
  0x11   : > { %s2131_s20 = scalar_lea.vmem %s3240_s0, %s1842_s17  ;;  %s2005_s28 = smov 21   ;;  %vm228_vm0 = vcmask 187392   ;;  %vm261_vm1 = vcmask 179200   ;;  %v2036_v45 = vmov 22   ;;  %v2037_v49 = vmov 14  }
  0x12   : > { %v2134_v2 = vld [vmem:[%s2131_s20 + $0x8] sm:$0xff]  ;;  %v2137_v3 = vld [vmem:[%s2131_s20] sm:$0xff]  ;;  %s2007_s29 = smov 29   ;;  %s2008_s30 = smov 1   ;;  %vm293_vm2 = vcmask 171008   ;;  %vm325_vm3 = vcmask 7168  }
  0x13   : > { %224 = vrot.lane.b32.xlu1 %v2134_v2, %s1999_s21  ;;  %220 = vrot.lane.b32.xlu0 %v2137_v3, %s1999_s21  ;;  %v2145_v4 = vcombine.high %v2134_v2, %v2134_v2  ;;  %v2157_v6 = vcombine.high %v2137_v3, %v2137_v3  ;;  %s2010_s5 = smov 127   ;;  %s2013_s6 = smov 99   ;;  %vm377_vm4 = vcmask 1039360   ;;  %vm410_vm5 = vcmask 875520  }
  0x14   : > { %s2014_s7 = smov 107   ;;  %s2016_s8 = smov 79   ;;  %vm443_vm6 = vcmask 867328   ;;  %vm476_vm7 = vcmask 859136   ;;  %vm512_vm8 = vcmask 375808   ;;  %vm544_vm9 = vcmask 359424  }
  0x15   : > { %s2017_s9 = smov 106   ;;  %s2019_s10 = smov 78   ;;  %vm576_vm10 = vcmask 343040   ;;  %vm608_vm11 = vcmask 15360   ;;  %vm660_vm12 = vcmask 1031168   ;;  %vm693_vm13 = vcmask 703488  }
  0x16   : > { %s2020_s11 = smov 105   ;;  %s2022_s12 = smov 77   ;;  %vm3277_vm14 = vcmask 687104   ;;  %vm3276_vm15 = vcmask 670720  }
  0x17   : > { %239 = vperm.xlu1 %1945, %v2150_v5   ;;  %215 = vrot.lane.b32.xlu0 %v2145_v4, %s2000_s24  ;;  %s2023_s13 = smov 74   ;;  %s2024_s14 = smov 46  }
  0x18   : > { %s2026_s17 = smov 72   ;;  %s2027_s18 = smov 44  }
  0x19   : > { %s2029_s19 = smov 70   ;;  %s2030_s22 = smov 42  }
  0x1a   : > { %s2032_s23 = smov 30  }
  0x1b   : > { %226 = vrot.lane.b32.xlu0 %v2145_v4, %s1999_s21  ;;  %222 = vrot.lane.b32.xlu1 %v2157_v6, %s1999_s21 }
  0x1c   : > { %1946 = vset.pattern.permute.xlu1 %v3254_v7 }
  0x1f   : > { %250 = vrot.lane.b32.xlu0 %v2145_v4, %s2002_s25  ;;  %253 = vrot.lane.b32.xlu1 %v2137_v3, %s2003_s26  ;;  %s2033_s25 = smov 2  }
  0x23   : > { %255 = vrot.lane.b32.xlu0 %v2157_v6, %s2003_s26  ;;  %257 = vrot.lane.b32.xlu1 %v2134_v2, %s2003_s26 }
  0x27   : > { %259 = vrot.lane.b32.xlu0 %v2145_v4, %s2003_s26  ;;  %271 = vperm.xlu1 %1946, %v2150_v5   ;;  %s2035_s26 = smov 126  }
  0x2b   : > { %282 = vrot.lane.b32.xlu0 %v2145_v4, %s2004_s27  ;;  %285 = vrot.lane.b32.xlu1 %v2137_v3, %s2005_s28  ;;  %s2038_s27 = smov 98  }
  0x2c   : > { %1947 = vset.pattern.permute.xlu1 %v3252_v8 }
  0x2f   : > { %287 = vrot.lane.b32.xlu0 %v2157_v6, %s2005_s28  ;;  %289 = vrot.lane.b32.xlu1 %v2134_v2, %s2005_s28 }
  0x33   : > { %291 = vrot.lane.b32.xlu0 %v2145_v4, %s2005_s28  ;;  %303 = vperm.xlu1 %1947, %v2150_v5   ;;  %s2039_s28 = smov 86  }
  0x37   : > { %314 = vrot.lane.b32.xlu0 %v2145_v4, %s2007_s29  ;;  %317 = vrot.lane.b32.xlu1 %v2137_v3, %s2008_s30 }
  0x38   : > { %1948 = vset.pattern.permute.xlu1 %v3256_v9 }
  0x3b   : > { %319 = vrot.lane.b32.xlu0 %v2157_v6, %s2008_s30  ;;  %321 = vrot.lane.b32.xlu1 %v2134_v2, %s2008_s30 }
  0x3f   : > { %323 = vrot.lane.b32.xlu0 %v2145_v4, %s2008_s30  ;;  %335 = vperm.xlu1 %1948, %v2150_v5   ;;  %s2040_s30 = smov 58  }
  0x43   : > { %347 = vperm.xlu0 %1949, %v2150_v5   ;;  %369 = vrot.lane.b32.xlu1 %v2137_v3, %s2010_s5 }
  0x44   : > { %1950 = vset.pattern.permute.xlu1 %v3248_v10 }
  0x47   : > { %373 = vrot.lane.b32.xlu0 %v2134_v2, %s2010_s5  ;;  %371 = vrot.lane.b32.xlu1 %v2157_v6, %s2010_s5 }
  0x48   : > { %1958 = vset.pattern.permute.xlu0 %v2012_v11 }
  0x4b   : > { %385 = vrot.lane.b32.xlu0 %v2137_v3, %s2013_s6  ;;  %375 = vrot.lane.b32.xlu1 %v2145_v4, %s2010_s5 }
  0x4f   : > { %402 = vrot.lane.b32.xlu0 %v2137_v3, %s2014_s7  ;;  %391 = vperm.xlu1 %1950, %v2150_v5  }
  0x53   : > { %406 = vrot.lane.b32.xlu0 %v2134_v2, %s2014_s7  ;;  %404 = vrot.lane.b32.xlu1 %v2157_v6, %s2014_s7 }
  0x54   : > { %1951 = vset.pattern.permute.xlu1 %v3255_v12 }
  0x57   : > { %418 = vrot.lane.b32.xlu0 %v2137_v3, %s2016_s8  ;;  %408 = vrot.lane.b32.xlu1 %v2145_v4, %s2014_s7  ;;  %s2043_s7 = smov 84   ;;  %s2044_s8 = smov 56  }
  0x5b   : > { %435 = vrot.lane.b32.xlu0 %v2137_v3, %s2017_s9  ;;  %424 = vperm.xlu1 %1951, %v2150_v5  }
  0x5f   : > { %439 = vrot.lane.b32.xlu0 %v2134_v2, %s2017_s9  ;;  %437 = vrot.lane.b32.xlu1 %v2157_v6, %s2017_s9 }
  0x60   : > { %1952 = vset.pattern.permute.xlu1 %v3247_v13 }
  0x63   : > { %451 = vrot.lane.b32.xlu0 %v2137_v3, %s2019_s10  ;;  %441 = vrot.lane.b32.xlu1 %v2145_v4, %s2017_s9  ;;  %s2046_s9 = smov 82   ;;  %s2047_s10 = smov 54  }
  0x67   : > { %468 = vrot.lane.b32.xlu0 %v2137_v3, %s2020_s11  ;;  %457 = vperm.xlu1 %1952, %v2150_v5  }
  0x6b   : > { %472 = vrot.lane.b32.xlu0 %v2134_v2, %s2020_s11  ;;  %470 = vrot.lane.b32.xlu1 %v2157_v6, %s2020_s11 }
  0x6c   : > { %1953 = vset.pattern.permute.xlu1 %v3246_v14 }
  0x6f   : > { %484 = vrot.lane.b32.xlu0 %v2137_v3, %s2022_s12  ;;  %474 = vrot.lane.b32.xlu1 %v2145_v4, %s2020_s11  ;;  %s2049_s11 = smov 97  }
  0x73   : > { %501 = vrot.lane.b32.xlu0 %v2145_v4, %s2023_s13  ;;  %490 = vperm.xlu1 %1953, %v2150_v5   ;;  %s2050_s13 = smov 69  }
  0x77   : > { %506 = vrot.lane.b32.xlu0 %v2157_v6, %s2024_s14  ;;  %504 = vrot.lane.b32.xlu1 %v2137_v3, %s2024_s14 }
  0x78   : > { %1954 = vset.pattern.permute.xlu1 %v3253_v15 }
  0x7b   : > { %510 = vrot.lane.b32.xlu0 %v2145_v4, %s2024_s14  ;;  %508 = vrot.lane.b32.xlu1 %v2134_v2, %s2024_s14  ;;  %s2052_s14 = smov 94  }
  0x7f   : > { %533 = vrot.lane.b32.xlu0 %v2145_v4, %s2026_s17  ;;  %522 = vperm.xlu1 %1954, %v2150_v5   ;;  %s2053_s17 = smov 66  }
  0x83   : > { %538 = vrot.lane.b32.xlu0 %v2157_v6, %s2027_s18  ;;  %536 = vrot.lane.b32.xlu1 %v2137_v3, %s2027_s18 }
  0x84   : > { %1955 = vset.pattern.permute.xlu1 %v3245_v16 }
  0x85   : > { %v2231_v17 = vpop.permute.xlu0 %220  ;;  %v225_v22 = vpop.permute.xlu1 %224 }
  0x87   : > { %542 = vrot.lane.b32.xlu0 %v2145_v4, %s2027_s18  ;;  %540 = vrot.lane.b32.xlu1 %v2134_v2, %s2027_s18  ;;  %s2055_s18 = smov 91  }
  0x89   : > { %v2235_v18 = vpop.permute.xlu0 %215 }
  0x8b   : > { %565 = vrot.lane.b32.xlu0 %v2145_v4, %s2029_s19  ;;  %554 = vperm.xlu1 %1955, %v2150_v5   ;;  %s2056_s19 = smov 63  }
  0x8d   : > { %v227_v19 = vpop.permute.xlu0 %226 }
  0x8e   : > { %v231_v32 = vsel %vm228_vm0, %v225_v22, %v227_v19  ;;  %v2041_v19 = vmov 839922192  }
  0x8f   : > { %570 = vrot.lane.b32.xlu0 %v2157_v6, %s2030_s22  ;;  %568 = vrot.lane.b32.xlu1 %v2137_v3, %s2030_s22 }
  0x90   : > { %1956 = vset.pattern.permute.xlu1 %v3250_v20 }
  0x91   : > { %v2242_v21 = vpop.permute.xlu0 %250 }
  0x93   : > { %574 = vrot.lane.b32.xlu0 %v2145_v4, %s2030_s22  ;;  %572 = vrot.lane.b32.xlu1 %v2134_v2, %s2030_s22  ;;  %s2058_s22 = smov 31  }
  0x95   : > { %v256_v23 = vpop.permute.xlu0 %255 }
  0x96   : > { %v2246_v24 = vpop.permute.xlu1 %239 }
  0x97   : > { %597 = vrot.lane.b32.xlu0 %v2145_v4, %s2032_s23  ;;  %586 = vperm.xlu1 %1956, %v2150_v5   ;;  %v245_v34 = vmul.f32 %v2246_v24, %v231_v32  ;;  %s2059_s23 = smov 3  }
  0x99   : > { %v260_v26 = vpop.permute.xlu0 %259 }
  0x9a   : > { %v223_v25 = vpop.permute.xlu1 %222 }
  0x9b   : > { %602 = vrot.lane.b32.xlu0 %v2157_v6, %s2033_s25  ;;  %600 = vrot.lane.b32.xlu1 %v2137_v3, %s2033_s25  ;;  %v229_v31 = vsel %vm228_vm0, %v2231_v17, %v223_v25  ;;  %v230_v33 = vsel %vm228_vm0, %v223_v25, %v225_v22  ;;  %v350_v22 = vunpack.c.l.s4 %v2041_v19 }
  0x9c   : > { %1957 = vset.pattern.permute.xlu1 %v2034_v27  ;;  %v243_v35 = vmul.f32 %v2246_v24, %v229_v31  ;;  %v244_v41 = vmul.f32 %v2246_v24, %v230_v33 }
  0x9d   : > { %v2256_v29 = vpop.permute.xlu0 %282 }
  0x9e   : > { %v2252_v28 = vpop.permute.xlu1 %253 }
  0x9f   : > { %606 = vrot.lane.b32.xlu0 %v2145_v4, %s2033_s25  ;;  %604 = vrot.lane.b32.xlu1 %v2134_v2, %s2033_s25  ;;  %v262_v36 = vsel %vm261_vm1, %v2252_v28, %v256_v23  ;;  %s2061_s25 = smov 125  }
  0xa1   : > { %v288_v40 = vpop.permute.xlu0 %287 }
  0xa2   : > { %v258_v30 = vpop.permute.xlu1 %257 }
  0xa3   : > { %630 = vperm.xlu0 %1958, %v2150_v5   ;;  %618 = vperm.xlu1 %1957, %v2150_v5   ;;  %v263_v37 = vsel %vm261_vm1, %v256_v23, %v258_v30  ;;  %v264_v38 = vsel %vm261_vm1, %v258_v30, %v260_v26  ;;  %v352_v23 = vlaneseq  ;;  %v2042_v26 = vmov 15  }
  0xa4   : > { %v351_v30 = vunpack.c.0.s8 %v350_v22 }
  0xa5   : > { %v292_v51 = vpop.permute.xlu0 %291  ;;  %v2306_v31 = vshrl.u32 %v352_v23, 7 }
  0xa6   : > { %v2270_v39 = vpop.permute.xlu1 %271 }
  0xa7   : > { %v275_v42 = vmul.f32 %v2270_v39, %v262_v36  ;;  %v276_v43 = vmul.f32 %v2270_v39, %v263_v37  ;;  %v277_v44 = vmul.f32 %v2270_v39, %v264_v38  ;;  %656 = vrot.lane.b32.xlu0 %v2134_v2, %s2035_s26  ;;  %652 = vrot.lane.b32.xlu1 %v2137_v3, %s2035_s26 }
  0xa8   : > { %1967 = vset.pattern.permute.xlu0 %v2036_v45  ;;  %1959 = vset.pattern.permute.xlu1 %v2037_v49 }
  0xa9   : > { %v279_v46 = vadd.f32 %v275_v42, %v243_v35  ;;  %v280_v47 = vadd.f32 %v276_v43, %v244_v41  ;;  %v281_v48 = vadd.f32 %v277_v44, %v245_v34  ;;  %v2289_v56 = vpop.permute.xlu0 %314  ;;  %v2315_v34 = vsub.s32 %v351_v30, %v2306_v31 }
  0xaa   : > { %v2278_v50 = vpop.permute.xlu1 %285 }
  0xab   : > { %668 = vrot.lane.b32.xlu0 %v2137_v3, %s2038_s27  ;;  %654 = vrot.lane.b32.xlu1 %v2157_v6, %s2035_s26  ;;  %v294_v53 = vsel %vm293_vm2, %v2278_v50, %v288_v40  ;;  %s2064_s27 = smov 37  }
  0xad   : > { %v320_v25 = vpop.permute.xlu0 %319 }
  0xae   : > { %v290_v52 = vpop.permute.xlu1 %289 }
  0xaf   : > { %685 = vrot.lane.b32.xlu0 %v2137_v3, %s2039_s28  ;;  %658 = vrot.lane.b32.xlu1 %v2145_v4, %s2035_s26  ;;  %v295_v54 = vsel %vm293_vm2, %v288_v40, %v290_v52  ;;  %v296_v55 = vsel %vm293_vm2, %v290_v52, %v292_v51  ;;  %s2063_s26 = smov 65  }
  0xb1   : > { %v324_v32 = vpop.permute.xlu0 %323 }
  0xb2   : > { %v2291_v57 = vpop.permute.xlu1 %303 }
  0xb3   : > { %v307_v58 = vmul.f32 %v2291_v57, %v294_v53  ;;  %v308_v59 = vmul.f32 %v2291_v57, %v295_v54  ;;  %v309_v60 = vmul.f32 %v2291_v57, %v296_v55  ;;  %689 = vrot.lane.b32.xlu0 %v2134_v2, %s2039_s28  ;;  %674 = vperm.xlu1 %1959, %v2150_v5  }
  0xb5   : > { %v311_v61 = vadd.f32 %v307_v58, %v279_v46  ;;  %v313_v62 = vadd.f32 %v309_v60, %v281_v48  ;;  %v312_v63 = vadd.f32 %v308_v59, %v280_v47  ;;  %v2045_v48 = vmov 16  }
  0xb6   : > { %v2299_v11 = vpop.permute.xlu1 %317 }
  0xb7   : > { %701 = vrot.lane.b32.xlu0 %v2137_v3, %s2040_s30  ;;  %687 = vrot.lane.b32.xlu1 %v2157_v6, %s2039_s28  ;;  %v326_v36 = vsel %vm325_vm3, %v2299_v11, %v320_v25  ;;  %s2067_s30 = smov 34  }
  0xb8   : > { %1960 = vset.pattern.permute.xlu1 %v2042_v26 }
  0xba   : > { %v322_v27 = vpop.permute.xlu1 %321 }
  0xbb   : > { %718 = vrot.lane.b32.xlu0 %v2137_v3, %s2043_s7  ;;  %691 = vrot.lane.b32.xlu1 %v2145_v4, %s2039_s28  ;;  %v327_v35 = vsel %vm325_vm3, %v320_v25, %v322_v27  ;;  %v328_v38 = vsel %vm325_vm3, %v322_v27, %v324_v32  ;;  %v2048_v32 = vmov 17   ;;  %s2065_s28 = smov 62  }
  0xbe   : > { %v2310_v33 = vpop.permute.xlu1 %335 }
  0xbf   : > { %722 = vrot.lane.b32.xlu0 %v2134_v2, %s2043_s7  ;;  %707 = vperm.xlu1 %1960, %v2150_v5   ;;  %v340_v37 = vmul.f32 %v2310_v33, %v327_v35  ;;  %v339_v40 = vmul.f32 %v2310_v33, %v326_v36  ;;  %v341_v43 = vmul.f32 %v2310_v33, %v328_v38 }
  0xc1   : > { %v344_v45 = vadd.f32 %v340_v37, %v312_v63  ;;  %v343_v49 = vadd.f32 %v339_v40, %v311_v61  ;;  %v345_v53 = vadd.f32 %v341_v43, %v313_v62 }
  0xc2   : > { %v348_v41 = vpop.permute.xlu0 %347  ;;  %v2324_v42 = vpop.permute.xlu1 %369 }
  0xc3   : > { %v355_v44 = vrot.slane %v348_v41, %v2315_v34  ;;  %734 = vrot.lane.b32.xlu0 %v2137_v3, %s2044_s8  ;;  %720 = vrot.lane.b32.xlu1 %v2157_v6, %s2043_s7  ;;  %s2086_s8 = smov 109  }
  0xc4   : > { %1961 = vset.pattern.permute.xlu1 %v2045_v48 }
  0xc5   : > { %v2332_v46 = vmul.f32 %v355_v44, %v2137_v3  ;;  %v358_v47 = vmul.f32 %v355_v44, %v2134_v2 }
  0xc6   : > { %v374_v51 = vpop.permute.xlu0 %373  ;;  %v2335_v52 = vpop.permute.xlu1 %371 }
  0xc7   : > { %v361_v54 = vcombine.high %v2332_v46, %v2332_v46  ;;  %v362_v55 = vcombine.high %v358_v47, %v358_v47  ;;  %v367_v58 = vadd.f32 %v358_v47, %v344_v45  ;;  %751 = vrot.lane.b32.xlu0 %v2137_v3, %s2046_s9  ;;  %724 = vrot.lane.b32.xlu1 %v2145_v4, %s2043_s7  ;;  %s2068_s7 = smov 59  }
  0xc8   : > { %v379_v62 = vsel %vm377_vm4, %v2335_v52, %v374_v51 }
  0xc9   : > { %v366_v59 = vadd.f32 %v361_v54, %v343_v49  ;;  %v2342_v60 = vadd.f32 %v362_v55, %v345_v53 }
  0xca   : > { %v2344_v63 = vpop.permute.xlu0 %385  ;;  %v2346_v61 = vpop.permute.xlu1 %375 }
  0xcb   : > { %755 = vrot.lane.b32.xlu0 %v2134_v2, %s2046_s9  ;;  %740 = vperm.xlu1 %1961, %v2150_v5   ;;  %v380_v19 = vsel %vm377_vm4, %v374_v51, %v2346_v61  ;;  %v2051_v51 = vmov 18  }
  0xce   : > { %v2354_v22 = vpop.permute.xlu0 %402  ;;  %v2356_v23 = vpop.permute.xlu1 %391 }
  0xcf   : > { %v395_v25 = vmul.f32 %v2356_v23, %v379_v62  ;;  %v396_v26 = vmul.f32 %v2356_v23, %v380_v19  ;;  %767 = vrot.lane.b32.xlu0 %v2137_v3, %s2047_s10  ;;  %753 = vrot.lane.b32.xlu1 %v2157_v6, %s2046_s9 }
  0xd0   : > { %1962 = vset.pattern.permute.xlu1 %v2048_v32 }
  0xd1   : > { %v399_v27 = vadd.f32 %v395_v25, %v366_v59  ;;  %v400_v30 = vadd.f32 %v396_v26, %v367_v58 }
  0xd2   : > { %v407_v35 = vpop.permute.xlu0 %406  ;;  %v2362_v36 = vpop.permute.xlu1 %404 }
  0xd3   : > { %784 = vrot.lane.b32.xlu0 %v2145_v4, %s2049_s11  ;;  %757 = vrot.lane.b32.xlu1 %v2145_v4, %s2046_s9  ;;  %v412_v40 = vsel %vm410_vm5, %v2362_v36, %v407_v35  ;;  %s2088_s9 = smov 113  }
  0xd6   : > { %v2367_v37 = vpop.permute.xlu0 %418  ;;  %v2369_v38 = vpop.permute.xlu1 %408 }
  0xd7   : > { %789 = vrot.lane.b32.xlu0 %v2157_v6, %s2050_s13  ;;  %773 = vperm.xlu1 %1962, %v2150_v5   ;;  %v413_v41 = vsel %vm410_vm5, %v407_v35, %v2369_v38  ;;  %v2054_v35 = vmov 19  }
  0xda   : > { %v2377_v43 = vpop.permute.xlu0 %435  ;;  %v2379_v44 = vpop.permute.xlu1 %424 }
  0xdb   : > { %v428_v45 = vmul.f32 %v2379_v44, %v412_v40  ;;  %v429_v47 = vmul.f32 %v2379_v44, %v413_v41  ;;  %793 = vrot.lane.b32.xlu0 %v2145_v4, %s2050_s13  ;;  %787 = vrot.lane.b32.xlu1 %v2137_v3, %s2050_s13 }
  0xdc   : > { %1963 = vset.pattern.permute.xlu1 %v2051_v51 }
  0xdd   : > { %v432_v48 = vadd.f32 %v428_v45, %v399_v27  ;;  %v433_v49 = vadd.f32 %v429_v47, %v400_v30 }
  0xde   : > { %v440_v53 = vpop.permute.xlu0 %439  ;;  %v2385_v54 = vpop.permute.xlu1 %437 }
  0xdf   : > { %816 = vrot.lane.b32.xlu0 %v2145_v4, %s2052_s14  ;;  %791 = vrot.lane.b32.xlu1 %v2134_v2, %s2050_s13  ;;  %v445_v59 = vsel %vm443_vm6, %v2385_v54, %v440_v53 }
  0xe2   : > { %v2389_v55 = vpop.permute.xlu0 %451  ;;  %v2391_v58 = vpop.permute.xlu1 %441 }
  0xe3   : > { %821 = vrot.lane.b32.xlu0 %v2157_v6, %s2053_s17  ;;  %805 = vperm.xlu1 %1963, %v2150_v5   ;;  %v446_v62 = vsel %vm443_vm6, %v440_v53, %v2391_v58 }
  0xe6   : > { %v2399_v19 = vpop.permute.xlu0 %468  ;;  %v2401_v25 = vpop.permute.xlu1 %457 }
  0xe7   : > { %3297 = vst [vmem:[#allocation2_spill] sm:$0xff] %v2399_v19  ;;  %v461_v26 = vmul.f32 %v2401_v25, %v445_v59  ;;  %v462_v27 = vmul.f32 %v2401_v25, %v446_v62  ;;  %825 = vrot.lane.b32.xlu0 %v2145_v4, %s2053_s17  ;;  %819 = vrot.lane.b32.xlu1 %v2137_v3, %s2053_s17 }
  0xe8   : > { %1964 = vset.pattern.permute.xlu1 %v2054_v35  ;;  %v2057_v35 = vmov 20  }
  0xe9   : > { %v465_v30 = vadd.f32 %v461_v26, %v432_v48  ;;  %v466_v32 = vadd.f32 %v462_v27, %v433_v49 }
  0xea   : > { %v473_v40 = vpop.permute.xlu0 %472  ;;  %v2407_v41 = vpop.permute.xlu1 %470 }
  0xeb   : > { %3298 = vst [vmem:[#allocation3_spill] sm:$0xff] %v2407_v41  ;;  %848 = vrot.lane.b32.xlu0 %v2145_v4, %s2055_s18  ;;  %823 = vrot.lane.b32.xlu1 %v2134_v2, %s2053_s17  ;;  %v478_v48 = vsel %vm476_vm7, %v2407_v41, %v473_v40  ;;  %s2071_s17 = smov 53   ;;  %s2072_s18 = smov 47  }
  0xee   : > { %v2411_v45 = vpop.permute.xlu0 %484  ;;  %v2413_v47 = vpop.permute.xlu1 %474 }
  0xef   : > { %3299 = vst [vmem:[#allocation4_spill] sm:$0xff] %v2413_v47  ;;  %853 = vrot.lane.b32.xlu0 %v2157_v6, %s2056_s19  ;;  %837 = vperm.xlu1 %1964, %v2150_v5   ;;  %v479_v49 = vsel %vm476_vm7, %v473_v40, %v2413_v47 }
  0xf2   : > { %v2421_v51 = vpop.permute.xlu0 %501  ;;  %v2423_v53 = vpop.permute.xlu1 %490 }
  0xf3   : > { %3300 = vst [vmem:[#allocation5_spill] sm:$0xff] %v2423_v53  ;;  %v494_v59 = vmul.f32 %v2423_v53, %v478_v48  ;;  %v495_v62 = vmul.f32 %v2423_v53, %v479_v49  ;;  %857 = vrot.lane.b32.xlu0 %v2145_v4, %s2056_s19  ;;  %851 = vrot.lane.b32.xlu1 %v2137_v3, %s2056_s19 }
  0xf4   : > { %1965 = vset.pattern.permute.xlu1 %v2057_v35 }
  0xf5   : > { %v2429_v26 = vadd.f32 %v494_v59, %v465_v30  ;;  %v2431_v27 = vadd.f32 %v495_v62, %v466_v32  ;;  %v2060_v59 = vmov 21  }
  0xf6   : > { %v507_v16 = vpop.permute.xlu0 %506  ;;  %v2433_v40 = vpop.permute.xlu1 %504 }
  0xf7   : > { %3301 = vst [vmem:[#allocation6_spill] sm:$0xff] %v2429_v26  ;;  %3302 = vst [vmem:[#allocation7_spill] sm:$0xff] %v2431_v27  ;;  %880 = vrot.lane.b32.xlu0 %v2145_v4, %s2058_s22  ;;  %855 = vrot.lane.b32.xlu1 %v2134_v2, %s2056_s19  ;;  %v513_v10 = vsel %vm512_vm8, %v2433_v40, %v507_v16  ;;  %s2073_s19 = smov 15  }
  0xfa   : > { %v511_v48 = vpop.permute.xlu0 %510  ;;  %v509_v49 = vpop.permute.xlu1 %508 }
  0xfb   : > { %885 = vrot.lane.b32.xlu0 %v2157_v6, %s2059_s23  ;;  %869 = vperm.xlu1 %1965, %v2150_v5   ;;  %v515_v1 = vsel %vm512_vm8, %v509_v49, %v511_v48 }
  0xfe   : > { %v2440_v30 = vpop.permute.xlu0 %533  ;;  %v2442_v32 = vpop.permute.xlu1 %522 }
  0xff   : > { %889 = vrot.lane.b32.xlu0 %v2145_v4, %s2059_s23  ;;  %883 = vrot.lane.b32.xlu1 %v2137_v3, %s2059_s23  ;;  %v526_v20 = vmul.f32 %v2442_v32, %v513_v10 }
 0x100   : > { %1966 = vset.pattern.permute.xlu1 %v2060_v59  ;;  %v514_v59 = vsel %vm512_vm8, %v507_v16, %v509_v49 }
 0x101   : > { %v527_v8 = vmul.f32 %v2442_v32, %v514_v59 }
 0x102   : > { %v539_v62 = vpop.permute.xlu0 %538  ;;  %v2446_v35 = vpop.permute.xlu1 %536 }
 0x103   : > { %913 = vperm.xlu0 %1967, %v2150_v5   ;;  %887 = vrot.lane.b32.xlu1 %v2134_v2, %s2059_s23  ;;  %v545_v15 = vsel %vm544_vm9, %v2446_v35, %v539_v62  ;;  %s2075_s23 = smov 121  }
 0x106   : > { %v543_v14 = vpop.permute.xlu0 %542  ;;  %v541_v13 = vpop.permute.xlu1 %540 }
 0x107   : > { %939 = vrot.lane.b32.xlu0 %v2134_v2, %s2061_s25  ;;  %901 = vperm.xlu1 %1966, %v2150_v5   ;;  %v546_v7 = vsel %vm544_vm9, %v539_v62, %v541_v13  ;;  %v547_v12 = vsel %vm544_vm9, %v541_v13, %v543_v14  ;;  %v2062_v62 = vmov 23  }
 0x108   : > { %1972 = vset.pattern.permute.xlu0 %v1997_v0  ;;  %v528_v0 = vmul.f32 %v2442_v32, %v515_v1 }
 0x10a   : > { %v2464_v9 = vpop.permute.xlu0 %565  ;;  %v2466_v27 = vpop.permute.xlu1 %554 }
 0x10b   : > { %v558_v16 = vmul.f32 %v2466_v27, %v545_v15  ;;  %v559_v48 = vmul.f32 %v2466_v27, %v546_v7  ;;  %v560_v10 = vmul.f32 %v2466_v27, %v547_v12  ;;  %951 = vrot.lane.b32.xlu0 %v2137_v3, %s2049_s11  ;;  %935 = vrot.lane.b32.xlu1 %v2137_v3, %s2061_s25 }
 0x10c   : > { %1968 = vset.pattern.permute.xlu1 %v2062_v62 }
 0x10d   : > { %v562_v49 = vadd.f32 %v558_v16, %v526_v20  ;;  %v563_v13 = vadd.f32 %v559_v48, %v527_v8  ;;  %v564_v14 = vadd.f32 %v560_v10, %v528_v0 }
 0x10e   : > { %v571_v59 = vpop.permute.xlu0 %570  ;;  %v2476_v26 = vpop.permute.xlu1 %568 }
 0x10f   : > { %968 = vrot.lane.b32.xlu0 %v2137_v3, %s2063_s26  ;;  %937 = vrot.lane.b32.xlu1 %v2157_v6, %s2061_s25  ;;  %v577_v8 = vsel %vm576_vm10, %v2476_v26, %v571_v59 }
 0x112   : > { %v575_v1 = vpop.permute.xlu0 %574  ;;  %v573_v7 = vpop.permute.xlu1 %572 }
 0x113   : > { %972 = vrot.lane.b32.xlu0 %v2134_v2, %s2063_s26  ;;  %941 = vrot.lane.b32.xlu1 %v2145_v4, %s2061_s25  ;;  %v578_v12 = vsel %vm576_vm10, %v571_v59, %v573_v7  ;;  %v579_v15 = vsel %vm576_vm10, %v573_v7, %v575_v1  ;;  %s2076_s25 = smov 35  }
 0x116   : > { %v2490_v20 = vpop.permute.xlu0 %597  ;;  %v2492_v0 = vpop.permute.xlu1 %586 }
 0x117   : > { %3303 = vst [vmem:[#allocation8_spill] sm:$0xff] %v2490_v20  ;;  %v590_v16 = vmul.f32 %v2492_v0, %v577_v8  ;;  %v591_v48 = vmul.f32 %v2492_v0, %v578_v12  ;;  %v592_v10 = vmul.f32 %v2492_v0, %v579_v15  ;;  %984 = vrot.lane.b32.xlu0 %v2137_v3, %s2064_s27  ;;  %v2066_v8 = vmov 24  }
 0x118   : > { %957 = vperm.xlu1 %1968, %v2150_v5  }
 0x119   : > { %v594_v62 = vadd.f32 %v590_v16, %v562_v49  ;;  %v595_v59 = vadd.f32 %v591_v48, %v563_v13  ;;  %v596_v19 = vadd.f32 %v592_v10, %v564_v14 }
 0x11a   : > { %v603_v1 = vpop.permute.xlu0 %602  ;;  %v2500_v7 = vpop.permute.xlu1 %600 }
 0x11b   : > { %3304 = vst [vmem:[#allocation9_spill] sm:$0xff] %v2500_v7  ;;  %1001 = vrot.lane.b32.xlu0 %v2137_v3, %s2065_s28  ;;  %v609_v49 = vsel %vm608_vm11, %v2500_v7, %v603_v1 }
 0x11c   : > { %970 = vrot.lane.b32.xlu1 %v2157_v6, %s2063_s26 }
 0x11d   : > { %1969 = vset.pattern.permute.xlu1 %v2066_v8 }
 0x11e   : > { %v607_v12 = vpop.permute.xlu0 %606  ;;  %v605_v15 = vpop.permute.xlu1 %604 }
 0x11f   : > { %1005 = vrot.lane.b32.xlu0 %v2134_v2, %s2065_s28  ;;  %v610_v13 = vsel %vm608_vm11, %v603_v1, %v605_v15  ;;  %v611_v48 = vsel %vm608_vm11, %v605_v15, %v607_v12 }
 0x120   : > { %974 = vrot.lane.b32.xlu1 %v2145_v4, %s2063_s26  ;;  %s2080_s26 = smov 11  }
 0x122   : > { %v631_v14 = vpop.permute.xlu0 %630  ;;  %v2513_v16 = vpop.permute.xlu1 %618 }
 0x123   : > { %3305 = vst [vmem:[#allocation10_spill] sm:$0xff] %v2513_v16  ;;  %v638_v10 = vrot.slane %v631_v14, %v2315_v34  ;;  %v622_v8 = vmul.f32 %v2513_v16, %v609_v49  ;;  %v623_v41 = vmul.f32 %v2513_v16, %v610_v13  ;;  %1017 = vrot.lane.b32.xlu0 %v2137_v3, %s2067_s30  ;;  %s2083_s30 = smov 95  }
 0x124   : > { %v624_v53 = vmul.f32 %v2513_v16, %v611_v48  ;;  %990 = vperm.xlu1 %1969, %v2150_v5   ;;  %v2069_v16 = vmov 25  }
 0x125   : > { %v2523_v1 = vmul.f32 %v638_v10, %v2137_v3  ;;  %v641_v20 = vmul.f32 %v638_v10, %v2134_v2  ;;  %v626_v7 = vadd.f32 %v622_v8, %v594_v62  ;;  %v627_v12 = vadd.f32 %v623_v41, %v595_v59 }
 0x126   : > { %v628_v15 = vadd.f32 %v624_v53, %v596_v19  ;;  %v657_v14 = vpop.permute.xlu0 %656  ;;  %v2526_v47 = vpop.permute.xlu1 %652 }
 0x127   : > { %3306 = vst [vmem:[#allocation11_spill] sm:$0xff] %v2523_v1  ;;  %3307 = vst [vmem:[#allocation12_spill] sm:$0xff] %v2526_v47  ;;  %v644_v49 = vcombine.high %v2523_v1, %v2523_v1  ;;  %v645_v13 = vcombine.high %v641_v20, %v641_v20  ;;  %1034 = vrot.lane.b32.xlu0 %v2137_v3, %s2068_s7  ;;  %v650_v48 = vadd.f32 %v641_v20, %v627_v12  ;;  %v2554_v20 = vld [vmem:[%s3242_s2] sm:$0xf] }
 0x128   : > { %1003 = vrot.lane.b32.xlu1 %v2157_v6, %s2065_s28 }
 0x129   : > { %1970 = vset.pattern.permute.xlu1 %v2069_v16  ;;  %v649_v62 = vadd.f32 %v644_v49, %v626_v7  ;;  %v2534_v41 = vadd.f32 %v645_v13, %v628_v15  ;;  %v2070_v15 = vmov 26  }
 0x12a   : > { %v2536_v19 = vpop.permute.xlu0 %668  ;;  %v2538_v53 = vpop.permute.xlu1 %654 }
 0x12b   : > { %3308 = vst [vmem:[#allocation13_spill] sm:$0xff] %v2534_v41  ;;  %3309 = vst [vmem:[#allocation14_spill] sm:$0xff] %v2536_v19  ;;  %1038 = vrot.lane.b32.xlu0 %v2134_v2, %s2068_s7  ;;  %v662_v2 = vsel %vm660_vm12, %v2538_v53, %v657_v14 }
 0x12c   : > { %3310 = vst [vmem:[#allocation15_spill] sm:$0xff] %v2538_v53  ;;  %1007 = vrot.lane.b32.xlu1 %v2145_v4, %s2065_s28  ;;  %s2082_s28 = smov 117  }
 0x12e   : > { %v2544_v59 = vpop.permute.xlu0 %685  ;;  %v2546_v10 = vpop.permute.xlu1 %658 }
 0x12f   : > { %3311 = vst [vmem:[#allocation16_spill] sm:$0xff] %v2544_v59  ;;  %3312 = vst [vmem:[#allocation17_spill] sm:$0xff] %v2546_v10  ;;  %1050 = vrot.lane.b32.xlu0 %v2137_v3, %s2058_s22  ;;  %v663_v16 = vsel %vm660_vm12, %v657_v14, %v2546_v10  ;;  %v3316_v14 = vmov 3   ;;  %s2074_s22 = smov 41  }
 0x130   : > { %1023 = vperm.xlu1 %1970, %v2150_v5  }
 0x132   : > { %v690_v7 = vpop.permute.xlu0 %689  ;;  %v2560_v8 = vpop.permute.xlu1 %674 }
 0x133   : > { %3313 = vst [vmem:[#allocation18_spill] sm:$0xff] %v2560_v8  ;;  %1085 = vperm.xlu0 %1972, %v2554_v20   ;;  %v678_v3 = vmul.f32 %v2560_v8, %v662_v2  ;;  %v679_v12 = vmul.f32 %v2560_v8, %v663_v16 }
 0x134   : > { %1036 = vrot.lane.b32.xlu1 %v2157_v6, %s2068_s7  ;;  %v3319_v6 = vmov 6  }
 0x135   : > { %1971 = vset.pattern.permute.xlu1 %v2070_v15  ;;  %v682_v49 = vadd.f32 %v678_v3, %v649_v62  ;;  %v683_v13 = vadd.f32 %v679_v12, %v650_v48 }
 0x136   : > { %v2567_v59 = vpop.permute.xlu0 %701  ;;  %v2569_v41 = vpop.permute.xlu1 %687 }
 0x137   : > { %3314 = vst [vmem:[#allocation19_spill] sm:$0xff] %v2567_v59  ;;  %3315 = vst [vmem:[#allocation20_spill] sm:$0xff] %v2569_v41  ;;  %1975 = vset.pattern.permute.xlu0 %v3316_v14  ;;  %v695_v62 = vsel %vm693_vm13, %v2569_v41, %v690_v7  ;;  %v3321_v14 = vmov 1  }
 0x138   : > { %1040 = vrot.lane.b32.xlu1 %v2145_v4, %s2068_s7  ;;  %1169 = vperm.xlu0 %1975, %v2554_v20  }
 0x13a   : > { %v2575_v2 = vpop.permute.xlu0 %718  ;;  %v2577_v16 = vpop.permute.xlu1 %691 }
 0x13b   : > { %3317 = vst [vmem:[#allocation21_spill] sm:$0xff] %v2575_v2  ;;  %3318 = vst [vmem:[#allocation22_spill] sm:$0xff] %v2577_v16  ;;  %v696_v4 = vsel %vm693_vm13, %v690_v7, %v2577_v16  ;;  %v3325_v7 = vmov 2  }
 0x13c   : > { %1056 = vperm.xlu1 %1971, %v2150_v5   ;;  %1978 = vset.pattern.permute.xlu0 %v3319_v6  ;;  %v3322_v5 = vmov 9  }
 0x13d   : > { %1253 = vperm.xlu0 %1978, %v2554_v20  }
 0x13e   : > { %v723_v48 = vpop.permute.xlu0 %722  ;;  %v2586_v3 = vpop.permute.xlu1 %707 }
 0x13f   : > { %3320 = vst [vmem:[#allocation23_spill] sm:$0xff] %v2586_v3  ;;  %v711_v12 = vmul.f32 %v2586_v3, %v695_v62  ;;  %v712_v15 = vmul.f32 %v2586_v3, %v696_v4  ;;  %v3327_v4 = vmov 11  }
 0x140   : > { %1973 = vset.pattern.permute.xlu1 %v3321_v14 }
 0x141   : > { %1113 = vperm.xlu1 %1973, %v2554_v20   ;;  %1981 = vset.pattern.permute.xlu0 %v3322_v5  ;;  %v715_v6 = vadd.f32 %v711_v12, %v682_v49  ;;  %v716_v2 = vadd.f32 %v712_v15, %v683_v13  ;;  %v3329_v5 = vmov 4  }
 0x142   : > { %1337 = vperm.xlu0 %1981, %v2554_v20   ;;  %v2594_v41 = vpop.permute.xlu0 %734  ;;  %v2596_v59 = vpop.permute.xlu1 %720 }
 0x143   : > { %3323 = vst [vmem:[#allocation24_spill] sm:$0xff] %v2594_v41  ;;  %3324 = vst [vmem:[#allocation25_spill] sm:$0xff] %v2596_v59  ;;  %v728_v13 = vsel %vm3277_vm14, %v2596_v59, %v723_v48 }
 0x145   : > { %1974 = vset.pattern.permute.xlu1 %v3325_v7 }
 0x146   : > { %1141 = vperm.xlu1 %1974, %v2554_v20   ;;  %v2600_v62 = vpop.permute.xlu0 %751  ;;  %1984 = vset.pattern.permute.xlu0 %v3327_v4  ;;  %v2603_v14 = vpop.permute.xlu1 %724 }
 0x147   : > { %3326 = vst [vmem:[#allocation26_spill] sm:$0xff] %v2600_v62  ;;  %3328 = vst [vmem:[#allocation27_spill] sm:$0xff] %v2603_v14  ;;  %v729_v12 = vsel %vm3277_vm14, %v723_v48, %v2603_v14  ;;  %v3336_v14 = vmov 7   ;;  %vm827_vm14 = vcmask 539648  }
 0x14a   : > { %1976 = vset.pattern.permute.xlu1 %v3329_v5  ;;  %v756_v49 = vpop.permute.xlu0 %755  ;;  %v2611_v15 = vpop.permute.xlu1 %740  ;;  %v3332_v5 = vmov 5  }
 0x14b   : > { %1197 = vperm.xlu1 %1976, %v2554_v20   ;;  %3330 = vst [vmem:[#allocation28_spill] sm:$0xff] %v2611_v15  ;;  %v744_v7 = vmul.f32 %v2611_v15, %v728_v13  ;;  %v745_v62 = vmul.f32 %v2611_v15, %v729_v12 }
 0x14d   : > { %v748_v41 = vadd.f32 %v744_v7, %v715_v6  ;;  %v749_v3 = vadd.f32 %v745_v62, %v716_v2 }
 0x14e   : > { %v2615_v16 = vpop.permute.xlu0 %767  ;;  %v2618_v1 = vpop.permute.xlu1 %753 }
 0x14f   : > { %3331 = vst [vmem:[#allocation29_spill] sm:$0xff] %v2615_v16  ;;  %1977 = vset.pattern.permute.xlu1 %v3332_v5  ;;  %3333 = vst [vmem:[#allocation30_spill] sm:$0xff] %v2618_v1  ;;  %v761_v2 = vsel %vm3276_vm15, %v2618_v1, %v756_v49  ;;  %v3338_v5 = vmov 8   ;;  %v3342_v1 = vmov 10  }
 0x150   : > { %1225 = vperm.xlu1 %1977, %v2554_v20  }
 0x152   : > { %v2621_v59 = vpop.permute.xlu0 %784  ;;  %v2623_v48 = vpop.permute.xlu1 %757 }
 0x153   : > { %3334 = vst [vmem:[#allocation31_spill] sm:$0xff] %v2621_v59  ;;  %3335 = vst [vmem:[#allocation32_spill] sm:$0xff] %v2623_v48  ;;  %v762_v6 = vsel %vm3276_vm15, %v756_v49, %v2623_v48  ;;  %vm3287_vm15 = vcmask 564224  }
 0x154   : > { %1979 = vset.pattern.permute.xlu1 %v3336_v14 }
 0x155   : > { %1281 = vperm.xlu1 %1979, %v2554_v20  }
 0x156   : > { %v790_v13 = vpop.permute.xlu0 %789  ;;  %v2631_v62 = vpop.permute.xlu1 %773 }
 0x157   : > { %3337 = vst [vmem:[#allocation33_spill] sm:$0xff] %v2631_v62  ;;  %v777_v12 = vmul.f32 %v2631_v62, %v761_v2  ;;  %v778_v7 = vmul.f32 %v2631_v62, %v762_v6 }
 0x159   : > { %1980 = vset.pattern.permute.xlu1 %v3338_v5  ;;  %v2636_v59 = vadd.f32 %v777_v12, %v748_v41  ;;  %v2638_v14 = vadd.f32 %v778_v7, %v749_v3 }
 0x15a   : > { %1309 = vperm.xlu1 %1980, %v2554_v20   ;;  %v794_v16 = vpop.permute.xlu0 %793  ;;  %v2641_v15 = vpop.permute.xlu1 %787 }
 0x15b   : > { %3339 = vst [vmem:[#allocation34_spill] sm:$0xff] %v2636_v59  ;;  %3340 = vst [vmem:[#allocation35_spill] sm:$0xff] %v2638_v14 }
 0x15c   : > { %3341 = vst [vmem:[#allocation36_spill] sm:$0xff] %v2641_v15 }
 0x15e   : > { %1982 = vset.pattern.permute.xlu1 %v3342_v1  ;;  %v2644_v49 = vpop.permute.xlu0 %816  ;;  %v792_v2 = vpop.permute.xlu1 %791  ;;  %v796_v1 = vsel %vm3287_vm15, %v2641_v15, %v790_v13 }
 0x15f   : > { %3343 = vst [vmem:[#allocation37_spill] sm:$0xff] %v2644_v49  ;;  %1365 = vperm.xlu1 %1982, %v2554_v20   ;;  %v797_v5 = vsel %vm3287_vm15, %v790_v13, %v792_v2  ;;  %v798_v14 = vsel %vm3287_vm15, %v792_v2, %v794_v16  ;;  %vm3290_vm15 = vcmask 515072  }
 0x162   : > { %v822_v48 = vpop.permute.xlu0 %821  ;;  %v2648_v6 = vpop.permute.xlu1 %805 }
 0x163   : > { %1983 = vset.pattern.permute.xlu1 %v3327_v4  ;;  %3344 = vst [vmem:[#allocation38_spill] sm:$0xff] %v2648_v6  ;;  %v809_v4 = vmul.f32 %v2648_v6, %v796_v1  ;;  %v811_v15 = vmul.f32 %v2648_v6, %v798_v14 }
 0x164   : > { %1393 = vperm.xlu1 %1983, %v2554_v20   ;;  %v810_v20 = vmul.f32 %v2648_v6, %v797_v5 }
 0x166   : > { %v826_v41 = vpop.permute.xlu0 %825  ;;  %v2651_v3 = vpop.permute.xlu1 %819 }
 0x167   : > { %3345 = vst [vmem:[#allocation39_spill] sm:$0xff] %v2651_v3  ;;  %v828_v49 = vsel %vm827_vm14, %v2651_v3, %v822_v48 }
 0x16a   : > { %v2653_v12 = vpop.permute.xlu0 %848  ;;  %v824_v7 = vpop.permute.xlu1 %823 }
 0x16b   : > { %3346 = vst [vmem:[#allocation40_spill] sm:$0xff] %v2653_v12  ;;  %v829_v62 = vsel %vm827_vm14, %v822_v48, %v824_v7  ;;  %v830_v12 = vsel %vm827_vm14, %v824_v7, %v826_v41 }
 0x16e   : > { %v854_v59 = vpop.permute.xlu0 %853  ;;  %v2665_v8 = vpop.permute.xlu1 %837 }
 0x16f   : > { %3347 = vst [vmem:[#allocation41_spill] sm:$0xff] %v2665_v8  ;;  %v841_v13 = vmul.f32 %v2665_v8, %v828_v49  ;;  %v842_v16 = vmul.f32 %v2665_v8, %v829_v62  ;;  %v843_v2 = vmul.f32 %v2665_v8, %v830_v12  ;;  %v1988_v8 = vld [vmem:[%s2131_s20 + $0x8] sm:$0xff] }
 0x171   : > { %v845_v1 = vadd.f32 %v841_v13, %v809_v4  ;;  %v846_v10 = vadd.f32 %v842_v16, %v810_v20  ;;  %v847_v5 = vadd.f32 %v843_v2, %v811_v15 }
 0x172   : > { %v858_v19 = vpop.permute.xlu0 %857  ;;  %v2671_v47 = vpop.permute.xlu1 %851 }
 0x173   : > { %3348 = vst [vmem:[#allocation42_spill] sm:$0xff] %v2671_v47  ;;  %v860_v14 = vsel %vm3290_vm15, %v2671_v47, %v854_v59 }
 0x176   : > { %v2673_v3 = vpop.permute.xlu0 %880  ;;  %v856_v48 = vpop.permute.xlu1 %855 }
 0x177   : > { %3349 = vst [vmem:[#allocation43_spill] sm:$0xff] %v2673_v3  ;;  %v861_v49 = vsel %vm3290_vm15, %v854_v59, %v856_v48  ;;  %v862_v62 = vsel %vm3290_vm15, %v856_v48, %v858_v19  ;;  %vm3296_vm15 = vcmask 23552   ;;  %v1987_v19 = vld [vmem:[%s2131_s20] sm:$0xff]  ;;  %s1843_s20 = sshll.u32 %s3404_s16, 3 }
 0x178   : > { %s3090_s14 = scalar_lea.vmem %s3243_s3, %s1843_s20  ;;  %s2089_s20 = smov 103  }
 0x17a   : > { %v886_v41 = vpop.permute.xlu0 %885  ;;  %v2679_v12 = vpop.permute.xlu1 %869 }
 0x17b   : > { %3350 = vst [vmem:[#allocation44_spill] sm:$0xff] %v2679_v12  ;;  %v873_v15 = vmul.f32 %v2679_v12, %v860_v14  ;;  %v874_v7 = vmul.f32 %v2679_v12, %v861_v49  ;;  %v875_v4 = vmul.f32 %v2679_v12, %v862_v62 }
 0x17d   : > { %v877_v20 = vadd.f32 %v873_v15, %v845_v1  ;;  %v878_v13 = vadd.f32 %v874_v7, %v846_v10  ;;  %v879_v16 = vadd.f32 %v875_v4, %v847_v5 }
 0x17e   : > { %v890_v2 = vpop.permute.xlu0 %889  ;;  %v2684_v3 = vpop.permute.xlu1 %883 }
 0x17f   : > { %3351 = vst [vmem:[#allocation45_spill] sm:$0xff] %v2684_v3  ;;  %v892_v49 = vsel %vm3296_vm15, %v2684_v3, %v886_v41 }
 0x182   : > { %v914_v47 = vpop.permute.xlu0 %913  ;;  %v888_v6 = vpop.permute.xlu1 %887 }
 0x183   : > { %v921_v59 = vrot.slane %v914_v47, %v2315_v34  ;;  %v893_v1 = vsel %vm3296_vm15, %v886_v41, %v888_v6  ;;  %v894_v5 = vsel %vm3296_vm15, %v888_v6, %v890_v2  ;;  %vm943_vm15 = vcmask 1022976  }
 0x185   : > { %v2688_v48 = vmul.f32 %v1987_v19, %v921_v59  ;;  %v924_v14 = vmul.f32 %v1988_v8, %v921_v59 }
 0x186   : > { %v940_v53 = vpop.permute.xlu0 %939  ;;  %v2697_v62 = vpop.permute.xlu1 %901 }
 0x187   : > { %3352 = vst [vmem:[#allocation46_spill] sm:$0xff] %v2688_v48  ;;  %v927_v10 = vcombine.high %v2688_v48, %v2688_v48  ;;  %v928_v34 = vcombine.high %v924_v14, %v924_v14  ;;  %v905_v47 = vmul.f32 %v2697_v62, %v892_v49  ;;  %v906_v15 = vmul.f32 %v2697_v62, %v893_v1 }
 0x188   : > { %v907_v8 = vmul.f32 %v2697_v62, %v894_v5  ;;  %v236_v1 = vsel %vm228_vm0, %v2235_v18, %v2231_v17  ;;  %v333_v17 = vsel %vm325_vm3, %v2289_v56, %v2299_v11  ;;  %vm388_vm0 = vcmask 809984  }
 0x189   : > { %v909_v7 = vadd.f32 %v905_v47, %v877_v20  ;;  %v910_v4 = vadd.f32 %v906_v15, %v878_v13  ;;  %v269_v20 = vsel %vm261_vm1, %v2242_v21, %v2252_v28  ;;  %v389_v56 = vsel %vm388_vm0, %v2346_v61, %v2344_v63 }
 0x18a   : > { %v911_v59 = vadd.f32 %v907_v8, %v879_v16  ;;  %v2702_v19 = vpop.permute.xlu0 %951  ;;  %v2704_v3 = vpop.permute.xlu1 %935  ;;  %v274_v16 = vmul.f32 %v2270_v39, %v269_v20  ;;  %v397_v8 = vmul.f32 %v2356_v23, %v389_v56  ;;  %vm421_vm1 = vcmask 646144  }
 0x18b   : > { %v932_v48 = vadd.f32 %v927_v10, %v909_v7  ;;  %v933_v41 = vadd.f32 %v924_v14, %v910_v4  ;;  %v301_v14 = vsel %vm293_vm2, %v2256_v29, %v2278_v50  ;;  %v242_v10 = vmul.f32 %v2246_v24, %v236_v1 }
 0x18c   : > { %v2706_v12 = vadd.f32 %v928_v34, %v911_v59  ;;  %v306_v5 = vmul.f32 %v2291_v57, %v301_v14  ;;  %v338_v24 = vmul.f32 %v2310_v33, %v333_v17  ;;  %v2748_v4 = vsub.s32 0, %v2306_v31  ;;  %v3357_v17 = vld [vmem:[#allocation5_spill] sm:$0xff] }
 0x18d   : > { %v278_v29 = vadd.f32 %v274_v16, %v242_v10  ;;  %v378_v59 = vsel %vm377_vm4, %v2324_v42, %v2335_v52  ;;  %vm454_vm2 = vcmask 637952   ;;  %vm487_vm0 = vcmask 629760  }
 0x18e   : > { %v2708_v6 = vpop.permute.xlu0 %968  ;;  %v2710_v2 = vpop.permute.xlu1 %937  ;;  %v394_v61 = vmul.f32 %v2356_v23, %v378_v59  ;;  %v422_v42 = vsel %vm421_vm1, %v2369_v38, %v2367_v37  ;;  %vm976_vm4 = vcmask 531456   ;;  %v455_v23 = vsel %vm454_vm2, %v2391_v58, %v2389_v55  ;;  %v3353_v55 = vld [vmem:[#allocation4_spill] sm:$0xff] }
 0x18f   : > { %v945_v18 = vsel %vm943_vm15, %v2710_v2, %v940_v53  ;;  %v310_v57 = vadd.f32 %v306_v5, %v278_v29  ;;  %v444_v37 = vsel %vm443_vm6, %v2377_v43, %v2385_v54  ;;  %v463_v38 = vmul.f32 %v2401_v25, %v455_v23  ;;  %v3359_v29 = vld [vmem:[#allocation2_spill] sm:$0xff] }
 0x190   : > { %v488_v58 = vsel %vm487_vm0, %v3353_v55, %v2411_v45  ;;  %v460_v5 = vmul.f32 %v2401_v25, %v444_v37  ;;  %v2813_v25 = vsub.s32 1, %v2306_v31  ;;  %v2816_v59 = vsub.s32 3, %v2306_v31  ;;  %v3364_v23 = vld [vmem:[#allocation18_spill] sm:$0xff] }
 0x191   : > { %v342_v7 = vadd.f32 %v338_v24, %v310_v57  ;;  %vm704_vm6 = vcmask 474112   ;;  %vm1020_vm1 = vcmask 277504   ;;  %vm1053_vm2 = vcmask 252928  }
 0x192   : > { %v973_v49 = vpop.permute.xlu0 %972  ;;  %v2718_v13 = vpop.permute.xlu1 %941  ;;  %vm3385_vm0 = vcmask 670720  }
 0x193   : > { %v946_v21 = vsel %vm943_vm15, %v940_v53, %v2718_v13  ;;  %v365_v33 = vadd.f32 %v2332_v46, %v342_v7  ;;  %v552_v46 = vsel %vm544_vm9, %v2440_v30, %v2446_v35  ;;  %v3356_v35 = vld [vmem:[#allocation10_spill] sm:$0xff]  ;;  %vm1009_vm9 = vcmask 506880  }
 0x194   : > { %v557_v20 = vmul.f32 %v2466_v27, %v552_v46 }
 0x195   : > { %v398_v45 = vadd.f32 %v394_v61, %v365_v33 }
 0x196   : > { %v2726_v34 = vpop.permute.xlu0 %984 }
 0x197   : > { %v2735_v28 = vpop.permute.xlu1 %957 }
 0x198   : > { %v961_v39 = vmul.f32 %v2735_v28, %v945_v18  ;;  %v962_v50 = vmul.f32 %v2735_v28, %v946_v21  ;;  %v496_v18 = vmul.f32 %v3357_v17, %v488_v58  ;;  %v3358_v21 = vld [vmem:[#allocation3_spill] sm:$0xff] }
 0x199   : > { %v477_v24 = vsel %vm476_vm7, %v3359_v29, %v3358_v21  ;;  %vm737_vm7 = vcmask 457728   ;;  %v3366_v58 = vld [vmem:[#allocation11_spill] sm:$0xff]  ;;  %v3373_v21 = vld [vmem:[#allocation16_spill] sm:$0xff] }
 0x19a   : > { %v965_v11 = vadd.f32 %v961_v39, %v932_v48  ;;  %v966_v47 = vadd.f32 %v962_v50, %v933_v41  ;;  %v2742_v15 = vpop.permute.xlu0 %1001  ;;  %v401_v48 = vadd.f32 %v397_v8, %v2342_v60  ;;  %v411_v41 = vsel %vm410_vm5, %v2354_v22, %v2362_v36 }
 0x19b   : > { %v2745_v53 = vpop.permute.xlu1 %970  ;;  %v427_v52 = vmul.f32 %v2379_v44, %v411_v41  ;;  %v430_v60 = vmul.f32 %v2379_v44, %v422_v42  ;;  %v520_v22 = vsel %vm512_vm8, %v2421_v51, %v2433_v40  ;;  %v584_v36 = vsel %vm576_vm10, %v2464_v9, %v2476_v26  ;;  %v3354_v51 = vld [vmem:[#allocation9_spill] sm:$0xff]  ;;  %v3355_v40 = vld [vmem:[#allocation8_spill] sm:$0xff] }
 0x19c   : > { %v525_v27 = vmul.f32 %v2442_v32, %v520_v22  ;;  %v589_v44 = vmul.f32 %v2492_v0, %v584_v36  ;;  %v616_v9 = vsel %vm608_vm11, %v3355_v40, %v3354_v51  ;;  %v978_v26 = vsel %vm976_vm4, %v2745_v53, %v973_v49  ;;  %v3367_v51 = vld [vmem:[#allocation19_spill] sm:$0xff]  ;;  %v3368_v40 = vld [vmem:[#allocation22_spill] sm:$0xff] }
 0x19d   : > { %v621_v0 = vmul.f32 %v3356_v35, %v616_v9  ;;  %v434_v10 = vadd.f32 %v430_v60, %v401_v48  ;;  %v431_v56 = vadd.f32 %v427_v52, %v398_v45  ;;  %v493_v7 = vmul.f32 %v3357_v17, %v477_v24  ;;  %v3362_v52 = vld [vmem:[#allocation14_spill] sm:$0xff] }
 0x19e   : > { %v2754_v63 = vpop.permute.xlu0 %1005  ;;  %v561_v32 = vadd.f32 %v557_v20, %v525_v27  ;;  %vm671_vm5 = vcmask 801792   ;;  %v2824_v42 = vsub.s32 2, %v2306_v31  ;;  %v3363_v20 = vld [vmem:[#allocation17_spill] sm:$0xff]  ;;  %vm770_vm8 = vcmask 441344  }
 0x19f   : > { %v2764_v1 = vpop.permute.xlu1 %974  ;;  %v467_v8 = vadd.f32 %v463_v38, %v434_v10  ;;  %v464_v48 = vadd.f32 %v460_v5, %v431_v56  ;;  %v672_v60 = vsel %vm671_vm5, %v3363_v20, %v3362_v52  ;;  %v705_v9 = vsel %vm704_vm6, %v3368_v40, %v3367_v51  ;;  %v3371_v5 = vld [vmem:[#allocation13_spill] sm:$0xff] }
 0x1a0   : > { %v979_v43 = vsel %vm976_vm4, %v973_v49, %v2764_v1  ;;  %v593_v49 = vadd.f32 %v589_v44, %v561_v32  ;;  %v680_v38 = vmul.f32 %v3364_v23, %v672_v60  ;;  %v3365_v44 = vld [vmem:[#allocation6_spill] sm:$0xff]  ;;  %v3370_v32 = vld [vmem:[#allocation23_spill] sm:$0xff]  ;;  %vm954_vm10 = vcmask 793600   ;;  %v3376_v52 = vld [vmem:[#allocation25_spill] sm:$0xff] }
 0x1a1   : > { %v2818_v41 = vadd.f32 %v496_v18, %v467_v8  ;;  %v2831_v37 = vadd.f32 %v493_v7, %v464_v48  ;;  %v1074_v55 = vrot.slane %v3365_v44, %v2748_v4  ;;  %v713_v35 = vmul.f32 %v3370_v32, %v705_v9  ;;  %v3372_v18 = vld [vmem:[#allocation20_spill] sm:$0xff]  ;;  %v3377_v20 = vld [vmem:[#allocation21_spill] sm:$0xff] }
 0x1a2   : > { %v2785_v30 = vpop.permute.xlu0 %1017  ;;  %v625_v61 = vadd.f32 %v621_v0, %v593_v49  ;;  %vm987_vm11 = vcmask 302080   ;;  %v684_v17 = vadd.f32 %v680_v38, %v3371_v5  ;;  %v694_v29 = vsel %vm693_vm13, %v3373_v21, %v3372_v18  ;;  %v3374_v7 = vld [vmem:[#allocation24_spill] sm:$0xff]  ;;  %v3382_v51 = vld [vmem:[#allocation33_spill] sm:$0xff] }
 0x1a3   : > { %v2797_v54 = vpop.permute.xlu1 %990  ;;  %v1082_v0 = vrot.slane %v2818_v41, %v2748_v4  ;;  %v710_v8 = vmul.f32 %v3370_v32, %v694_v29  ;;  %vm3378_vm13 = vcmask 687104   ;;  %v3381_v38 = vld [vmem:[#allocation32_spill] sm:$0xff]  ;;  %vm3390_vm5 = vcmask 564224  }
 0x1a4   : > { %v994_v16 = vmul.f32 %v2797_v54, %v978_v26  ;;  %v995_v14 = vmul.f32 %v2797_v54, %v979_v43  ;;  %v648_v31 = vadd.f32 %v3366_v58, %v625_v61  ;;  %v3369_v26 = vld [vmem:[#allocation7_spill] sm:$0xff]  ;;  %v727_v60 = vsel %vm3378_vm13, %v3377_v20, %v3376_v52 }
 0x1a5   : > { %v1078_v43 = vrot.slane %v3369_v26, %v2748_v4  ;;  %v3375_v61 = vld [vmem:[#allocation27_spill] sm:$0xff]  ;;  %vm3401_vm6 = vcmask 23552   ;;  %vm1535_vm13 = vcmask 913152  }
 0x1a6   : > { %v998_v39 = vadd.f32 %v994_v16, %v965_v11  ;;  %v999_v50 = vadd.f32 %v995_v14, %v966_v47  ;;  %v2807_v57 = vpop.permute.xlu0 %1034  ;;  %v3360_v11 = vld [vmem:[#allocation15_spill] sm:$0xff]  ;;  %v3361_v47 = vld [vmem:[#allocation12_spill] sm:$0xff]  ;;  %v1159_v16 = vrot.slane %v3365_v44, %v2816_v59  ;;  %v1163_v14 = vrot.slane %v3369_v26, %v2816_v59 }
 0x1a7   : > { %v2810_v33 = vpop.permute.xlu1 %1003  ;;  %v661_v46 = vsel %vm660_vm12, %v3361_v47, %v3360_v11  ;;  %vm1042_vm12 = vcmask 482304   ;;  %v738_v48 = vsel %vm737_vm7, %v3375_v61, %v3374_v7  ;;  %v3387_v7 = vld [vmem:[#allocation37_spill] sm:$0xff]  ;;  %vm1447_vm7 = vcmask 384000  }
 0x1a8   : > { %v677_v22 = vmul.f32 %v3364_v23, %v661_v46  ;;  %v1011_v24 = vsel %vm1009_vm9, %v2810_v33, %v2754_v63  ;;  %v717_v46 = vadd.f32 %v713_v35, %v684_v17  ;;  %v3379_v23 = vld [vmem:[#allocation28_spill] sm:$0xff]  ;;  %v955_v35 = vsel %vm954_vm10, %v2718_v13, %v2702_v19 }
 0x1a9   : > { %v988_v13 = vsel %vm987_vm11, %v2764_v1, %v2726_v34  ;;  %v3391_v1 = vld [vmem:[#allocation41_spill] sm:$0xff]  ;;  %vm1478_vm10 = vcmask 519552   ;;  %vm1497_vm11 = vcmask 650752  }
 0x1aa   : > { %v2829_v36 = vpop.permute.xlu0 %1038  ;;  %v681_v45 = vadd.f32 %v677_v22, %v648_v31  ;;  %v746_v22 = vmul.f32 %v3379_v23, %v738_v48  ;;  %v743_v31 = vmul.f32 %v3379_v23, %v727_v60  ;;  %v996_v48 = vmul.f32 %v2797_v54, %v988_v13 }
 0x1ab   : > { %v1008_v27 = vpop.permute.xlu1 %1007 }
 0x1ac   : > { %v1012_v49 = vsel %vm1009_vm9, %v2754_v63, %v1008_v27  ;;  %v3380_v63 = vld [vmem:[#allocation29_spill] sm:$0xff]  ;;  %v750_v19 = vadd.f32 %v746_v22, %v717_v46  ;;  %v3389_v46 = vld [vmem:[#allocation31_spill] sm:$0xff]  ;;  %v1021_v20 = vsel %vm1020_vm1, %v1008_v27, %v2785_v30  ;;  %v3393_v27 = vld [vmem:[#allocation42_spill] sm:$0xff]  ;;  %vm1554_vm1 = vcmask 1044352  }
 0x1ad   : > { %v771_v58 = vsel %vm770_vm8, %v3381_v38, %v3380_v63  ;;  %vm1450_vm8 = vcmask 388352  }
 0x1ae   : > { %v1051_v10 = vpop.permute.xlu0 %1050  ;;  %v779_v40 = vmul.f32 %v3382_v51, %v771_v58 }
 0x1af   : > { %v2857_v56 = vpop.permute.xlu1 %1023 }
 0x1b0   : > { %v1027_v11 = vmul.f32 %v2857_v56, %v1011_v24  ;;  %v1028_v47 = vmul.f32 %v2857_v56, %v1012_v49  ;;  %v714_v24 = vadd.f32 %v710_v8, %v681_v45  ;;  %v3384_v49 = vld [vmem:[#allocation26_spill] sm:$0xff]  ;;  %v3386_v8 = vld [vmem:[#allocation39_spill] sm:$0xff]  ;;  %v1029_v63 = vmul.f32 %v2857_v56, %v1021_v20 }
 0x1b1   : > { %v835_v61 = vsel %vm827_vm14, %v3387_v7, %v3386_v8  ;;  %vm3395_vm14 = vcmask 515072  }
 0x1b2   : > { %v1031_v9 = vadd.f32 %v1027_v11, %v998_v39  ;;  %v1032_v32 = vadd.f32 %v1028_v47, %v999_v50  ;;  %v2874_v5 = vpop.permute.xlu0 %1085  ;;  %v963_v39 = vmul.f32 %v2735_v28, %v955_v35  ;;  %v2906_v11 = vadd.f32 %v779_v40, %v750_v19  ;;  %v3388_v47 = vld [vmem:[#allocation36_spill] sm:$0xff]  ;;  %v3392_v40 = vld [vmem:[#allocation38_spill] sm:$0xff] }
 0x1b3   : > { %v2880_v17 = vmul.f32 %v2874_v5, %v1074_v55  ;;  %v2883_v18 = vmul.f32 %v2874_v5, %v1078_v43  ;;  %v2886_v21 = vmul.f32 %v2874_v5, %v1082_v0  ;;  %v2888_v29 = vpop.permute.xlu1 %1036  ;;  %v1167_v55 = vrot.slane %v2818_v41, %v2816_v59  ;;  %v3383_v0 = vld [vmem:[#allocation30_spill] sm:$0xff] }
 0x1b4   : > { %v1044_v50 = vsel %vm1042_vm12, %v2888_v29, %v2829_v36  ;;  %v747_v43 = vadd.f32 %v743_v31, %v714_v24  ;;  %v760_v45 = vsel %vm3385_vm0, %v3384_v49, %v3383_v0  ;;  %v803_v34 = vsel %vm3390_vm5, %v3389_v46, %v3388_v47  ;;  %v3398_v49 = vld [vmem:[#allocation44_spill] sm:$0xff] }
 0x1b5   : > { %v840_v52 = vmul.f32 %v3391_v1, %v835_v61  ;;  %v967_v22 = vadd.f32 %v963_v39, %v2706_v12  ;;  %v776_v31 = vmul.f32 %v3382_v51, %v760_v45  ;;  %v808_v35 = vmul.f32 %v3392_v40, %v803_v34  ;;  %v3394_v12 = vld [vmem:[#allocation40_spill] sm:$0xff]  ;;  %v3399_v34 = vld [vmem:[#allocation45_spill] sm:$0xff]  ;;  %v3400_v1 = vld [vmem:[#allocation43_spill] sm:$0xff] }
 0x1b6   : > { %v867_v39 = vsel %vm3395_vm14, %v3394_v12, %v3393_v27  ;;  %v1099_v40 = vrot.slane %v2831_v37, %v2813_v25  ;;  %v1107_v27 = vrot.slane %v3369_v26, %v2813_v25  ;;  %v1111_v12 = vrot.slane %v2818_v41, %v2813_v25 }
 0x1b7   : > { %v1041_v60 = vpop.permute.xlu1 %1040  ;;  %v2913_v23 = vpop.permute.xlu0 %1169  ;;  %v1000_v19 = vadd.f32 %v996_v48, %v967_v22  ;;  %v844_v51 = vadd.f32 %v840_v52, %v808_v35  ;;  %v872_v45 = vmul.f32 %v3398_v49, %v867_v39  ;;  %v899_v52 = vsel %vm3401_vm6, %v3400_v1, %v3399_v34 }
 0x1b8   : > { %v1045_v38 = vsel %vm1042_vm12, %v2829_v36, %v1041_v60  ;;  %v2920_v58 = vmul.f32 %v2913_v23, %v1159_v16  ;;  %v2925_v24 = vmul.f32 %v2913_v23, %v1163_v14  ;;  %v2928_v30 = vmul.f32 %v2913_v23, %v1167_v55  ;;  %v3396_v36 = vld [vmem:[#allocation34_spill] sm:$0xff]  ;;  %v3397_v16 = vld [vmem:[#allocation35_spill] sm:$0xff] }
 0x1b9   : > { %v1243_v13 = vrot.slane %v3396_v36, %v2824_v42  ;;  %v1247_v0 = vrot.slane %v3397_v16, %v2824_v42  ;;  %v1054_v14 = vsel %vm1053_vm2, %v1041_v60, %v1051_v10  ;;  %v1251_v55 = vrot.slane %v2906_v11, %v2824_v42 }
 0x1ba   : > { %v1033_v7 = vadd.f32 %v1029_v63, %v1000_v19  ;;  %v1103_v35 = vrot.slane %v3365_v44, %v2813_v25  ;;  %v2975_v39 = vadd.f32 %v776_v31, %v747_v43  ;;  %v1131_v43 = vrot.slane %v3365_v44, %v2824_v42 }
 0x1bb   : > { %v2939_v8 = vpop.permute.xlu1 %1056  ;;  %vm1575_vm2 = vcmask 89088   ;;  %vm1696_vm0 = vcmask 842752   ;;  %vm1704_vm5 = vcmask 56320   ;;  %vm1742_vm14 = vcmask 11264  }
 0x1bc   : > { %v1060_v61 = vmul.f32 %v2939_v8, %v1044_v50  ;;  %v1061_v48 = vmul.f32 %v2939_v8, %v1045_v38  ;;  %v1062_v47 = vmul.f32 %v2939_v8, %v1054_v14  ;;  %v2946_v46 = vpop.permute.xlu0 %1253  ;;  %v904_v50 = vmul.f32 %v2697_v62, %v899_v52  ;;  %v3402_v52 = vld [vmem:[#allocation46_spill] sm:$0xff] }
 0x1bd   : > { %v2952_v10 = vmul.f32 %v2946_v46, %v1243_v13  ;;  %v2955_v20 = vmul.f32 %v2946_v46, %v1247_v0  ;;  %v2958_v60 = vmul.f32 %v2946_v46, %v1251_v55  ;;  %v876_v62 = vadd.f32 %v872_v45, %v844_v51 }
 0x1be   : > { %v2961_v22 = vadd.f32 %v1060_v61, %v1031_v9  ;;  %v2963_v63 = vadd.f32 %v1061_v48, %v1032_v32  ;;  %v2965_v38 = vadd.f32 %v1062_v47, %v1033_v7  ;;  %v1070_v9 = vrot.slane %v2831_v37, %v2748_v4 }
 0x1bf   : > { %v908_v14 = vadd.f32 %v904_v50, %v876_v62  ;;  %v1155_v55 = vrot.slane %v2831_v37, %v2816_v59  ;;  %v1127_v7 = vrot.slane %v2831_v37, %v2824_v42  ;;  %v944_v48 = vsel %vm943_vm15, %v2704_v3, %v2710_v2 }
 0x1c0   : > { %v1114_v32 = vpop.permute.xlu1 %1113  ;;  %v1088_v31 = vmul.f32 %v2874_v5, %v1070_v9  ;;  %v1135_v47 = vrot.slane %v3369_v26, %v2824_v42  ;;  %v1139_v37 = vrot.slane %v2818_v41, %v2824_v42  ;;  %v1183_v44 = vrot.slane %v2975_v39, %v2748_v4 }
 0x1c1   : > { %v1116_v19 = vmul.f32 %v1114_v32, %v1099_v40  ;;  %v1117_v13 = vmul.f32 %v1114_v32, %v1103_v35  ;;  %v1118_v0 = vmul.f32 %v1114_v32, %v1107_v27  ;;  %v1119_v49 = vmul.f32 %v1114_v32, %v1111_v12 }
 0x1c2   : > { %v960_v5 = vmul.f32 %v2735_v28, %v944_v48  ;;  %v1187_v3 = vrot.slane %v3396_v36, %v2748_v4  ;;  %v931_v41 = vadd.f32 %v3402_v52, %v908_v14  ;;  %v1010_v28 = vsel %vm1009_vm9, %v2742_v15, %v2810_v33 }
 0x1c3   : > { %v1121_v51 = vadd.f32 %v1117_v13, %v2880_v17  ;;  %v1122_v45 = vadd.f32 %v1118_v0, %v2883_v18  ;;  %v1123_v61 = vadd.f32 %v1119_v49, %v2886_v21  ;;  %v977_v17 = vsel %vm976_vm4, %v2708_v6, %v2745_v53 }
 0x1c4   : > { %v1120_v18 = vadd.f32 %v1116_v19, %v1088_v31  ;;  %v993_v50 = vmul.f32 %v2797_v54, %v977_v17  ;;  %v1172_v40 = vmul.f32 %v2913_v23, %v1155_v55  ;;  %v964_v12 = vadd.f32 %v960_v5, %v931_v41 }
 0x1c5   : > { %v1142_v21 = vpop.permute.xlu1 %1141  ;;  %v1026_v62 = vmul.f32 %v2857_v56, %v1010_v28  ;;  %v1191_v9 = vrot.slane %v3397_v16, %v2748_v4  ;;  %v1195_v32 = vrot.slane %v2906_v11, %v2748_v4  ;;  %v1043_v56 = vsel %vm1042_vm12, %v2807_v57, %v2888_v29 }
 0x1c6   : > { %v1144_v2 = vmul.f32 %v1142_v21, %v1127_v7  ;;  %v1145_v34 = vmul.f32 %v1142_v21, %v1131_v43  ;;  %v1146_v26 = vmul.f32 %v1142_v21, %v1135_v47  ;;  %v1147_v1 = vmul.f32 %v1142_v21, %v1139_v37 }
 0x1c7   : > { %v997_v55 = vadd.f32 %v993_v50, %v964_v12  ;;  %v1059_v7 = vmul.f32 %v2939_v8, %v1043_v56  ;;  %v1239_v57 = vrot.slane %v2975_v39, %v2824_v42  ;;  %v1279_v52 = vrot.slane %v2906_v11, %v2816_v59  ;;  %v1338_v12 = vpop.permute.xlu0 %1337 }
 0x1c8   : > { %v1148_v6 = vadd.f32 %v1144_v2, %v1120_v18  ;;  %v1149_v53 = vadd.f32 %v1145_v34, %v1121_v51  ;;  %v1150_v35 = vadd.f32 %v1146_v26, %v1122_v45  ;;  %v1151_v27 = vadd.f32 %v1147_v1, %v1123_v61 }
 0x1c9   : > { %v1223_v45 = vrot.slane %v2906_v11, %v2813_v25  ;;  %v1030_v61 = vadd.f32 %v1026_v62, %v997_v55  ;;  %v1256_v17 = vmul.f32 %v2946_v46, %v1239_v57  ;;  %v1267_v34 = vrot.slane %v2975_v39, %v2816_v59 }
 0x1ca   : > { %v1176_v54 = vadd.f32 %v1172_v40, %v1148_v6  ;;  %v1177_v19 = vadd.f32 %v2920_v58, %v1149_v53  ;;  %v1178_v15 = vadd.f32 %v2925_v24, %v1150_v35  ;;  %v1179_v33 = vadd.f32 %v2928_v30, %v1151_v27  ;;  %v1198_v23 = vpop.permute.xlu1 %1197 }
 0x1cb   : > { %v1200_v13 = vmul.f32 %v1198_v23, %v1183_v44  ;;  %v1201_v0 = vmul.f32 %v1198_v23, %v1187_v3  ;;  %v1202_v49 = vmul.f32 %v1198_v23, %v1191_v9  ;;  %v1203_v14 = vmul.f32 %v1198_v23, %v1195_v32 }
 0x1cc   : > { %v1211_v58 = vrot.slane %v2975_v39, %v2813_v25  ;;  %v1215_v24 = vrot.slane %v3396_v36, %v2813_v25  ;;  %v1219_v30 = vrot.slane %v3397_v16, %v2813_v25  ;;  %v3032_v5 = vadd.f32 %v1059_v7, %v1030_v61 }
 0x1cd   : > { %v1205_v43 = vadd.f32 %v1201_v0, %v1177_v19  ;;  %v1206_v31 = vadd.f32 %v1202_v49, %v1178_v15  ;;  %v1207_v51 = vadd.f32 %v1203_v14, %v1179_v33  ;;  %v1204_v29 = vadd.f32 %v1200_v13, %v1176_v54 }
 0x1ce   : > { %v1271_v26 = vrot.slane %v3396_v36, %v2816_v59  ;;  %v1275_v1 = vrot.slane %v3397_v16, %v2816_v59  ;;  %v1323_v36 = vrot.slane %v3032_v5, %v2813_v25  ;;  %v1327_v16 = vrot.slane %v2961_v22, %v2813_v25 }
 0x1cf   : > { %v1226_v8 = vpop.permute.xlu1 %1225  ;;  %v1331_v11 = vrot.slane %v2963_v63, %v2813_v25  ;;  %v1295_v62 = vrot.slane %v3032_v5, %v2748_v4  ;;  %v1299_v9 = vrot.slane %v2961_v22, %v2748_v4  ;;  %v1303_v32 = vrot.slane %v2963_v63, %v2748_v4 }
 0x1d0   : > { %v1228_v48 = vmul.f32 %v1226_v8, %v1211_v58  ;;  %v1229_v47 = vmul.f32 %v1226_v8, %v1215_v24  ;;  %v1230_v37 = vmul.f32 %v1226_v8, %v1219_v30  ;;  %v1231_v44 = vmul.f32 %v1226_v8, %v1223_v45 }
 0x1d1   : > { %v1307_v54 = vrot.slane %v2965_v38, %v2748_v4  ;;  %v1340_v0 = vmul.f32 %v1338_v12, %v1323_v36  ;;  %v1341_v49 = vmul.f32 %v1338_v12, %v1327_v16  ;;  %v1342_v14 = vmul.f32 %v1338_v12, %v1331_v11 }
 0x1d2   : > { %v1232_v18 = vadd.f32 %v1228_v48, %v1204_v29  ;;  %v1233_v21 = vadd.f32 %v1229_v47, %v1205_v43  ;;  %v1234_v3 = vadd.f32 %v1230_v37, %v1206_v31  ;;  %v1235_v2 = vadd.f32 %v1231_v44, %v1207_v51 }
 0x1d3   : > { %v1351_v51 = vrot.slane %v3032_v5, %v2824_v42  ;;  %v1355_v4 = vrot.slane %v2961_v22, %v2824_v42  ;;  %v1359_v58 = vrot.slane %v2963_v63, %v2824_v42  ;;  %v1363_v24 = vrot.slane %v2965_v38, %v2824_v42 }
 0x1d4   : > { %v1260_v41 = vadd.f32 %v1256_v17, %v1232_v18  ;;  %v1261_v50 = vadd.f32 %v2952_v10, %v1233_v21  ;;  %v1262_v46 = vadd.f32 %v2955_v20, %v1234_v3  ;;  %v1263_v28 = vadd.f32 %v2958_v60, %v1235_v2  ;;  %v1282_v40 = vpop.permute.xlu1 %1281 }
 0x1d5   : > { %v1284_v6 = vmul.f32 %v1282_v40, %v1267_v34  ;;  %v1285_v53 = vmul.f32 %v1282_v40, %v1271_v26  ;;  %v1286_v39 = vmul.f32 %v1282_v40, %v1275_v1  ;;  %v1287_v35 = vmul.f32 %v1282_v40, %v1279_v52 }
 0x1d6   : > { %v1335_v10 = vrot.slane %v2965_v38, %v2813_v25  ;;  %v1379_v21 = vrot.slane %v3032_v5, %v2816_v59  ;;  %v1383_v3 = vrot.slane %v2961_v22, %v2816_v59  ;;  %v1387_v42 = vrot.slane %v2963_v63, %v2816_v59 }
 0x1d7   : > { %v1289_v20 = vadd.f32 %v1285_v53, %v1261_v50  ;;  %v1290_v27 = vadd.f32 %v1286_v39, %v1262_v46  ;;  %v1291_v60 = vadd.f32 %v1287_v35, %v1263_v28  ;;  %v1288_v19 = vadd.f32 %v1284_v6, %v1260_v41 }
 0x1d8   : > { %v1343_v55 = vmul.f32 %v1338_v12, %v1335_v10  ;;  %v1391_v2 = vrot.slane %v2965_v38, %v2816_v59  ;;  %vm1408_vm15 = vcmask 125952   ;;  %vm1426_vm4 = vcmask 257152  }
 0x1d9   : > { %v1310_v15 = vpop.permute.xlu1 %1309  ;;  %vm1456_vm9 = vcmask 121856   ;;  %vm1516_vm12 = vcmask 781952  }
 0x1da   : > { %v1312_v33 = vmul.f32 %v1310_v15, %v1295_v62  ;;  %v1313_v25 = vmul.f32 %v1310_v15, %v1299_v9  ;;  %v1314_v23 = vmul.f32 %v1310_v15, %v1303_v32  ;;  %v1315_v13 = vmul.f32 %v1310_v15, %v1307_v54 }
 0x1dc   : > { %v1316_v56 = vadd.f32 %v1312_v33, %v1288_v19  ;;  %v1317_v7 = vadd.f32 %v1313_v25, %v1289_v20  ;;  %v1318_v43 = vadd.f32 %v1314_v23, %v1290_v27  ;;  %v1319_v31 = vadd.f32 %v1315_v13, %v1291_v60 }
 0x1de   : > { %v1344_v30 = vadd.f32 %v1340_v0, %v1316_v56  ;;  %v1345_v45 = vadd.f32 %v1341_v49, %v1317_v7  ;;  %v1346_v61 = vadd.f32 %v1342_v14, %v1318_v43  ;;  %v1347_v57 = vadd.f32 %v1343_v55, %v1319_v31  ;;  %v1366_v29 = vpop.permute.xlu1 %1365 }
 0x1df   : > { %v1368_v8 = vmul.f32 %v1366_v29, %v1351_v51  ;;  %v1369_v48 = vmul.f32 %v1366_v29, %v1355_v4  ;;  %v1370_v47 = vmul.f32 %v1366_v29, %v1359_v58  ;;  %v1371_v37 = vmul.f32 %v1366_v29, %v1363_v24 }
 0x1e1   : > { %v1373_v44 = vadd.f32 %v1369_v48, %v1345_v45  ;;  %v1374_v17 = vadd.f32 %v1370_v47, %v1346_v61  ;;  %v1375_v18 = vadd.f32 %v1371_v37, %v1347_v57  ;;  %v1372_v34 = vadd.f32 %v1368_v8, %v1344_v30 }
 0x1e3   : > { %v1394_v26 = vpop.permute.xlu1 %1393 }
 0x1e4   : > { %v1396_v1 = vmul.f32 %v1394_v26, %v1379_v21  ;;  %v1397_v52 = vmul.f32 %v1394_v26, %v1383_v3  ;;  %v1398_v41 = vmul.f32 %v1394_v26, %v1387_v42  ;;  %v1399_v50 = vmul.f32 %v1394_v26, %v1391_v2 }
 0x1e6   : > { %v1400_v46 = vadd.f32 %v1396_v1, %v1372_v34  ;;  %v3078_v28 = vadd.f32 %v1397_v52, %v1373_v44  ;;  %v3080_v5 = vadd.f32 %v1398_v41, %v1374_v17  ;;  %v3082_v40 = vadd.f32 %v1399_v50, %v1375_v18 }
 0x1e8   : > { %1405 = vrot.lane.b32.xlu0 %v1400_v46, %s2068_s7  ;;  %v1414_v22 = vmul.f32 %v1400_v46, %v1400_v46  ;;  %v1443_v20 = vcombine.low %v1400_v46, %v3078_v28  ;;  %v3106_v27 = vmul.f32 %v3078_v28, %v3078_v28 }
 0x1ec   : > { %1416 = vrot.lane.b32.xlu0 %v1414_v22, %s2068_s7  ;;  %s2085_s7 = smov 115  }
 0x25a   : > { %v1406_v59 = vpop.permute.xlu0 %1405 }
 0x25b   : > { %1409 = vst.msk [vmem:[%s3090_s14] sm:$0xf] %vm1408_vm15, %v1406_v59  ;;  %v1410_v63 = vsel %vm1408_vm15, %v1406_v59, 0.0 }
 0x25c   : > { %1411 = vadd.xlane.f32.xlu1 %v1410_v63 }
 0x25e   : > { %v1417_v38 = vpop.permute.xlu0 %1416 }
 0x25f   : > { %v1419_v6 = vsel %vm1408_vm15, %v1417_v38, 0.0 }
 0x260   : > { %1420 = vadd.xlane.f32.xlu0 %v1419_v6  ;;  %v1571_v6 = vcombine.low %v3078_v28, %v3080_v5 }
 0x26d   : > { %1423 = vrot.lane.b32.xlu1 %v1400_v46, %s2071_s17 }
 0x276   : > { %1428 = vrot.lane.b32.xlu0 %v1400_v46, %s2064_s27 }
 0x27a   : > { %1435 = vrot.lane.b32.xlu0 %v1414_v22, %s2064_s27  ;;  %s2081_s27 = smov 5  }
 0x2e9   : > { %v1412_v53 = vpop.xlane.xlu1 %1411 }
 0x2ed   : > { %v1424_v39 = vpop.permute.xlu1 %1423  ;;  %v1421_v35 = vpop.xlane.xlu0 %1420 }
 0x2ee   : > { %1427 = vst.msk [vmem:[%s3090_s14] sm:$0xf] %vm1426_vm4, %v1424_v39 }
 0x2f1   : > { %v1429_v36 = vpop.permute.xlu0 %1428 }
 0x2f2   : > { %v1431_v16 = vsel %vm1408_vm15, %v1429_v36, 0.0 }
 0x2f3   : > { %1432 = vadd.xlane.f32.xlu1 %v1431_v16 }
 0x2f5   : > { %v1436_v11 = vpop.permute.xlu0 %1435 }
 0x2f6   : > { %v1438_v10 = vsel %vm1408_vm15, %v1436_v11, 0.0 }
 0x2f7   : > { %1439 = vadd.xlane.f32.xlu0 %v1438_v10 }
 0x304   : > { %1444 = vrot.lane.b32.xlu1 %v1443_v20, %s2072_s18 }
 0x308   : > { %1454 = vrot.lane.b32.xlu1 %v3078_v28, %s2073_s19 }
 0x30d   : > { %1452 = vrot.lane.b32.xlu0 %v1400_v46, %s2073_s19 }
 0x311   : > { %1465 = vrot.lane.b32.xlu0 %v1414_v22, %s2073_s19 }
 0x315   : > { %1467 = vrot.lane.b32.xlu0 %v3106_v27, %s2073_s19 }
 0x380   : > { %v1433_v60 = vpop.xlane.xlu1 %1432 }
 0x381   : > { %v1434_v49 = vadd.f32 %v1433_v60, %v1412_v53 }
 0x384   : > { %v1445_v12 = vpop.permute.xlu1 %1444  ;;  %v1440_v62 = vpop.xlane.xlu0 %1439 }
 0x385   : > { %v1446_v9 = vrot.slane %v1445_v12, 4  ;;  %v1441_v7 = vadd.f32 %v1440_v62, %v1421_v35  ;;  %v3166_v62 = vmul.f32 %v3080_v5, %v3080_v5 }
 0x387   : > { %v1448_v32 = vsel %vm1447_vm7, %v1445_v12, %v1446_v9 }
 0x388   : > { %1451 = vst.msk [vmem:[%s3090_s14] sm:$0xf] %vm1450_vm8, %v1448_v32  ;;  %v1455_v54 = vpop.permute.xlu1 %1454  ;;  %v1453_v19 = vpop.permute.xlu0 %1452 }
 0x389   : > { %v1457_v15 = vsel %vm1456_vm9, %v1453_v19, %v1455_v54 }
 0x38a   : > { %v1459_v33 = vsel %vm1408_vm15, %v1457_v15, 0.0 }
 0x38b   : > { %1460 = vadd.xlane.f32.xlu1 %v1459_v33 }
 0x38c   : > { %v1466_v25 = vpop.permute.xlu0 %1465 }
 0x390   : > { %v1468_v23 = vpop.permute.xlu0 %1467 }
 0x391   : > { %v1469_v13 = vsel %vm1456_vm9, %v1466_v25, %v1468_v23 }
 0x392   : > { %v1471_v0 = vsel %vm1408_vm15, %v1469_v13, 0.0 }
 0x393   : > { %1472 = vadd.xlane.f32.xlu0 %v1471_v0 }
 0x39c   : > { %1475 = vrot.lane.b32.xlu1 %v3078_v28, %s2074_s22 }
 0x3a9   : > { %1480 = vrot.lane.b32.xlu0 %v3078_v28, %s2075_s23 }
 0x3ad   : > { %1487 = vrot.lane.b32.xlu0 %v3106_v27, %s2075_s23 }
 0x418   : > { %v1461_v14 = vpop.xlane.xlu1 %1460 }
 0x419   : > { %v1462_v55 = vadd.f32 %v1461_v14, %v1434_v49 }
 0x41c   : > { %v1476_v56 = vpop.permute.xlu1 %1475 }
 0x41d   : > { %1479 = vst.msk [vmem:[%s3090_s14] sm:$0xf] %vm1478_vm10, %v1476_v56 }
 0x420   : > { %v1473_v43 = vpop.xlane.xlu0 %1472 }
 0x421   : > { %v1474_v31 = vadd.f32 %v1473_v43, %v1441_v7 }
 0x424   : > { %v1481_v51 = vpop.permute.xlu0 %1480 }
 0x425   : > { %v1483_v4 = vsel %vm1408_vm15, %v1481_v51, 0.0 }
 0x426   : > { %1484 = vadd.xlane.f32.xlu1 %v1483_v4 }
 0x428   : > { %v1488_v58 = vpop.permute.xlu0 %1487 }
 0x429   : > { %v1490_v24 = vsel %vm1408_vm15, %v1488_v58, 0.0 }
 0x42a   : > { %1491 = vadd.xlane.f32.xlu0 %v1490_v24 }
 0x437   : > { %1494 = vrot.lane.b32.xlu1 %v3078_v28, %s2076_s25 }
 0x440   : > { %1499 = vrot.lane.b32.xlu0 %v3078_v28, %s2013_s6 }
 0x444   : > { %1506 = vrot.lane.b32.xlu0 %v3106_v27, %s2013_s6  ;;  %s2077_s6 = smov 55  }
 0x4b3   : > { %v1485_v30 = vpop.xlane.xlu1 %1484 }
 0x4b4   : > { %v1486_v45 = vadd.f32 %v1485_v30, %v1462_v55 }
 0x4b7   : > { %v1495_v61 = vpop.permute.xlu1 %1494  ;;  %v1492_v57 = vpop.xlane.xlu0 %1491 }
 0x4b8   : > { %1498 = vst.msk [vmem:[%s3090_s14] sm:$0xf] %vm1497_vm11, %v1495_v61  ;;  %v1493_v29 = vadd.f32 %v1492_v57, %v1474_v31 }
 0x4bb   : > { %v1500_v8 = vpop.permute.xlu0 %1499 }
 0x4bc   : > { %v1502_v48 = vsel %vm1408_vm15, %v1500_v8, 0.0 }
 0x4bd   : > { %1503 = vadd.xlane.f32.xlu1 %v1502_v48 }
 0x4bf   : > { %v1507_v47 = vpop.permute.xlu0 %1506 }
 0x4c0   : > { %v1509_v37 = vsel %vm1408_vm15, %v1507_v47, 0.0 }
 0x4c1   : > { %1510 = vadd.xlane.f32.xlu0 %v1509_v37 }
 0x4ce   : > { %1513 = vrot.lane.b32.xlu1 %v3078_v28, %s2007_s29 }
 0x4d2   : > { %1518 = vrot.lane.b32.xlu1 %v3078_v28, %s2022_s12 }
 0x4d6   : > { %1525 = vrot.lane.b32.xlu1 %v3106_v27, %s2022_s12  ;;  %s2079_s12 = smov 33  }
 0x4da   : > { %1532 = vrot.lane.b32.xlu1 %v3078_v28, %s1999_s21  ;;  %s2078_s21 = smov 17  }
 0x54a   : > { %v1504_v44 = vpop.xlane.xlu1 %1503 }
 0x54b   : > { %v1505_v17 = vadd.f32 %v1504_v44, %v1486_v45 }
 0x54e   : > { %v1514_v18 = vpop.permute.xlu1 %1513  ;;  %v1511_v26 = vpop.xlane.xlu0 %1510 }
 0x54f   : > { %1517 = vst.msk [vmem:[%s3090_s14] sm:$0xf] %vm1516_vm12, %v1514_v18  ;;  %v1512_v41 = vadd.f32 %v1511_v26, %v1493_v29 }
 0x552   : > { %v1519_v21 = vpop.permute.xlu1 %1518 }
 0x553   : > { %v1521_v3 = vsel %vm1408_vm15, %v1519_v21, 0.0 }
 0x554   : > { %1522 = vadd.xlane.f32.xlu0 %v1521_v3 }
 0x556   : > { %v1526_v42 = vpop.permute.xlu1 %1525 }
 0x557   : > { %v1528_v2 = vsel %vm1408_vm15, %v1526_v42, 0.0 }
 0x558   : > { %1529 = vadd.xlane.f32.xlu0 %v1528_v2 }
 0x55a   : > { %v1533_v34 = vpop.permute.xlu1 %1532 }
 0x55b   : > { %1536 = vst.msk [vmem:[%s3090_s14] sm:$0xf] %vm1535_vm13, %v1533_v34 }
 0x56e   : > { %1537 = vrot.lane.b32.xlu0 %v3078_v28, %s2077_s6 }
 0x572   : > { %1544 = vrot.lane.b32.xlu0 %v3106_v27, %s2077_s6 }
 0x5e1   : > { %v1523_v1 = vpop.xlane.xlu0 %1522 }
 0x5e2   : > { %v1524_v52 = vadd.f32 %v1523_v1, %v1505_v17 }
 0x5e5   : > { %v1530_v50 = vpop.xlane.xlu0 %1529 }
 0x5e6   : > { %v1531_v46 = vadd.f32 %v1530_v50, %v1512_v41 }
 0x5e9   : > { %v1538_v22 = vpop.permute.xlu0 %1537 }
 0x5ea   : > { %v1540_v59 = vsel %vm1408_vm15, %v1538_v22, 0.0 }
 0x5eb   : > { %1541 = vadd.xlane.f32.xlu1 %v1540_v59 }
 0x5ed   : > { %v1545_v63 = vpop.permute.xlu0 %1544 }
 0x5ee   : > { %v1547_v38 = vsel %vm1408_vm15, %v1545_v63, 0.0 }
 0x5ef   : > { %1548 = vadd.xlane.f32.xlu0 %v1547_v38 }
 0x5fc   : > { %1551 = vrot.lane.b32.xlu1 %v3078_v28, %s2078_s21 }
 0x600   : > { %1556 = vrot.lane.b32.xlu1 %v3078_v28, %s2079_s12 }
 0x604   : > { %1563 = vrot.lane.b32.xlu1 %v3106_v27, %s2079_s12 }
 0x608   : > { %1572 = vrot.lane.b32.xlu1 %v1571_v6, %s2080_s26  ;;  %v1711_v6 = vmul.f32 %v3082_v40, %v3082_v40 }
 0x60c   : > { %1581 = vrot.lane.b32.xlu1 %v3080_v5, %s2080_s26 }
 0x678   : > { %v1542_v53 = vpop.xlane.xlu1 %1541 }
 0x679   : > { %v1543_v39 = vadd.f32 %v1542_v53, %v1524_v52  ;;  %v1692_v53 = vcombine.low %v3080_v5, %v3082_v40 }
 0x67c   : > { %v1552_v35 = vpop.permute.xlu1 %1551  ;;  %v1549_v9 = vpop.xlane.xlu0 %1548 }
 0x67d   : > { %1555 = vst.msk [vmem:[%s3090_s14] sm:$0xf] %vm1554_vm1, %v1552_v35  ;;  %v1550_v19 = vadd.f32 %v1549_v9, %v1531_v46 }
 0x680   : > { %v1557_v36 = vpop.permute.xlu1 %1556 }
 0x681   : > { %v1559_v16 = vsel %vm1408_vm15, %v1557_v36, 0.0 }
 0x682   : > { %1560 = vadd.xlane.f32.xlu0 %v1559_v16 }
 0x684   : > { %v1564_v11 = vpop.permute.xlu1 %1563 }
 0x685   : > { %v1566_v10 = vsel %vm1408_vm15, %v1564_v11, 0.0 }
 0x686   : > { %1567 = vadd.xlane.f32.xlu0 %v1566_v10 }
 0x688   : > { %v1573_v20 = vpop.permute.xlu1 %1572 }
 0x689   : > { %v1574_v60 = vrot.slane %v1573_v20, 4 }
 0x68b   : > { %v1576_v12 = vsel %vm1575_vm2, %v1573_v20, %v1574_v60 }
 0x68c   : > { %1578 = vst.msk [vmem:[%s3090_s14 + $0x4] sm:$0xf] %vm1408_vm15, %v1576_v12  ;;  %v1582_v25 = vpop.permute.xlu1 %1581 }
 0x69c   : > { %1579 = vrot.lane.b32.xlu0 %v3078_v28, %s2080_s26 }
 0x6a0   : > { %1591 = vrot.lane.b32.xlu0 %v3106_v27, %s2080_s26 }
 0x6a4   : > { %1593 = vrot.lane.b32.xlu0 %v3166_v62, %s2080_s26 }
 0x70f   : > { %v1561_v32 = vpop.xlane.xlu0 %1560 }
 0x710   : > { %v1562_v54 = vadd.f32 %v1561_v32, %v1543_v39 }
 0x713   : > { %v1568_v15 = vpop.xlane.xlu0 %1567 }
 0x714   : > { %v1569_v33 = vadd.f32 %v1568_v15, %v1550_v19 }
 0x717   : > { %v1580_v23 = vpop.permute.xlu0 %1579 }
 0x718   : > { %v1583_v13 = vsel %vm1575_vm2, %v1580_v23, %v1582_v25 }
 0x719   : > { %v1585_v28 = vsel %vm1408_vm15, %v1583_v13, 0.0 }
 0x71a   : > { %1586 = vadd.xlane.f32.xlu1 %v1585_v28 }
 0x71b   : > { %v1592_v27 = vpop.permute.xlu0 %1591 }
 0x71f   : > { %v1594_v0 = vpop.permute.xlu0 %1593 }
 0x720   : > { %v1595_v49 = vsel %vm1575_vm2, %v1592_v27, %v1594_v0 }
 0x721   : > { %v1597_v14 = vsel %vm1408_vm15, %v1595_v49, 0.0 }
 0x722   : > { %1598 = vadd.xlane.f32.xlu0 %v1597_v14 }
 0x72b   : > { %1601 = vrot.lane.b32.xlu1 %v3080_v5, %s2081_s27 }
 0x72f   : > { %1605 = vrot.lane.b32.xlu1 %v3080_v5, %s2082_s28 }
 0x733   : > { %1612 = vrot.lane.b32.xlu1 %v3166_v62, %s2082_s28 }
 0x737   : > { %1619 = vrot.lane.b32.xlu1 %v3080_v5, %s2010_s5  ;;  %s2084_s5 = smov 73  }
 0x7a7   : > { %v1587_v55 = vpop.xlane.xlu1 %1586 }
 0x7a8   : > { %v1588_v56 = vadd.f32 %v1587_v55, %v1562_v54 }
 0x7ab   : > { %v1602_v7 = vpop.permute.xlu1 %1601 }
 0x7ac   : > { %1604 = vst.msk [vmem:[%s3090_s14 + $0x4] sm:$0xf] %vm1426_vm4, %v1602_v7 }
 0x7af   : > { %v1606_v43 = vpop.permute.xlu1 %1605  ;;  %v1599_v24 = vpop.xlane.xlu0 %1598 }
 0x7b0   : > { %v1608_v31 = vsel %vm1408_vm15, %v1606_v43, 0.0  ;;  %v1600_v61 = vadd.f32 %v1599_v24, %v1569_v33 }
 0x7b1   : > { %1609 = vadd.xlane.f32.xlu0 %v1608_v31 }
 0x7b3   : > { %v1613_v51 = vpop.permute.xlu1 %1612 }
 0x7b4   : > { %v1615_v4 = vsel %vm1408_vm15, %v1613_v51, 0.0 }
 0x7b5   : > { %1616 = vadd.xlane.f32.xlu0 %v1615_v4 }
 0x7b7   : > { %v1620_v58 = vpop.permute.xlu1 %1619 }
 0x7b8   : > { %1622 = vst.msk [vmem:[%s3090_s14 + $0x4] sm:$0xf] %vm1450_vm8, %v1620_v58 }
 0x7cb   : > { %1623 = vrot.lane.b32.xlu0 %v3080_v5, %s2083_s30 }
 0x7cf   : > { %1630 = vrot.lane.b32.xlu0 %v3166_v62, %s2083_s30 }
 0x83e   : > { %v1610_v30 = vpop.xlane.xlu0 %1609 }
 0x83f   : > { %v1611_v45 = vadd.f32 %v1610_v30, %v1588_v56 }
 0x842   : > { %v1617_v57 = vpop.xlane.xlu0 %1616 }
 0x843   : > { %v1618_v29 = vadd.f32 %v1617_v57, %v1600_v61 }
 0x846   : > { %v1624_v8 = vpop.permute.xlu0 %1623 }
 0x847   : > { %v1626_v48 = vsel %vm1408_vm15, %v1624_v8, 0.0 }
 0x848   : > { %1627 = vadd.xlane.f32.xlu1 %v1626_v48 }
 0x84a   : > { %v1631_v47 = vpop.permute.xlu0 %1630 }
 0x84b   : > { %v1633_v37 = vsel %vm1408_vm15, %v1631_v47, 0.0 }
 0x84c   : > { %1634 = vadd.xlane.f32.xlu0 %v1633_v37 }
 0x859   : > { %1637 = vrot.lane.b32.xlu1 %v3080_v5, %s2075_s23 }
 0x85d   : > { %1641 = vrot.lane.b32.xlu1 %v3080_v5, %s2084_s5 }
 0x861   : > { %1648 = vrot.lane.b32.xlu1 %v3166_v62, %s2084_s5 }
 0x865   : > { %1655 = vrot.lane.b32.xlu1 %v3080_v5, %s2085_s7 }
 0x8d5   : > { %v1628_v44 = vpop.xlane.xlu1 %1627 }
 0x8d6   : > { %v1629_v17 = vadd.f32 %v1628_v44, %v1611_v45 }
 0x8d9   : > { %v1638_v18 = vpop.permute.xlu1 %1637  ;;  %v1635_v26 = vpop.xlane.xlu0 %1634 }
 0x8da   : > { %1640 = vst.msk [vmem:[%s3090_s14 + $0x4] sm:$0xf] %vm1478_vm10, %v1638_v18  ;;  %v1636_v41 = vadd.f32 %v1635_v26, %v1618_v29 }
 0x8dd   : > { %v1642_v21 = vpop.permute.xlu1 %1641 }
 0x8de   : > { %v1644_v3 = vsel %vm1408_vm15, %v1642_v21, 0.0 }
 0x8df   : > { %1645 = vadd.xlane.f32.xlu0 %v1644_v3 }
 0x8e1   : > { %v1649_v42 = vpop.permute.xlu1 %1648 }
 0x8e2   : > { %v1651_v2 = vsel %vm1408_vm15, %v1649_v42, 0.0 }
 0x8e3   : > { %1652 = vadd.xlane.f32.xlu0 %v1651_v2 }
 0x8e5   : > { %v1656_v34 = vpop.permute.xlu1 %1655 }
 0x8e6   : > { %1658 = vst.msk [vmem:[%s3090_s14 + $0x4] sm:$0xf] %vm1497_vm11, %v1656_v34 }
 0x8f9   : > { %1659 = vrot.lane.b32.xlu0 %v3080_v5, %s2000_s24 }
 0x8fd   : > { %1666 = vrot.lane.b32.xlu0 %v3166_v62, %s2000_s24  ;;  %s2087_s24 = smov 7  }
 0x96c   : > { %v1646_v1 = vpop.xlane.xlu0 %1645 }
 0x96d   : > { %v1647_v52 = vadd.f32 %v1646_v1, %v1629_v17 }
 0x970   : > { %v1653_v50 = vpop.xlane.xlu0 %1652 }
 0x971   : > { %v1654_v46 = vadd.f32 %v1653_v50, %v1636_v41 }
 0x974   : > { %v1660_v22 = vpop.permute.xlu0 %1659 }
 0x975   : > { %v1662_v59 = vsel %vm1408_vm15, %v1660_v22, 0.0 }
 0x976   : > { %1663 = vadd.xlane.f32.xlu1 %v1662_v59 }
 0x978   : > { %v1667_v63 = vpop.permute.xlu0 %1666 }
 0x979   : > { %v1669_v38 = vsel %vm1408_vm15, %v1667_v63, 0.0 }
 0x97a   : > { %1670 = vadd.xlane.f32.xlu0 %v1669_v38 }
 0x987   : > { %1673 = vrot.lane.b32.xlu1 %v3080_v5, %s2086_s8 }
 0x98b   : > { %1677 = vrot.lane.b32.xlu1 %v3080_v5, %s2007_s29 }
 0x98f   : > { %1684 = vrot.lane.b32.xlu1 %v3166_v62, %s2007_s29  ;;  %s1839_s29 = sshll.u32 %s3404_s16, 2 }
 0x990   : > { %s208_s17 = scalar_lea.vmem %s3244_s4, %s1839_s29 }
 0x993   : > { %1702 = vrot.lane.b32.xlu1 %v3082_v40, %s2087_s24 }
 0x997   : > { %1713 = vrot.lane.b32.xlu1 %v3166_v62, %s2087_s24 }
 0x99b   : > { %1715 = vrot.lane.b32.xlu1 %v1711_v6, %s2087_s24 }
 0x99f   : > { %1727 = vrot.lane.b32.xlu1 %v3082_v40, %s2088_s9 }
 0x9a3   : > { %1734 = vrot.lane.b32.xlu1 %v1711_v6, %s2088_s9 }
 0x9a7   : > { %1693 = vrot.lane.b32.xlu1 %v1692_v53, %s2089_s20 }
 0xa03   : > { %v1664_v39 = vpop.xlane.xlu1 %1663 }
 0xa04   : > { %v1665_v35 = vadd.f32 %v1664_v39, %v1647_v52 }
 0xa07   : > { %v1674_v36 = vpop.permute.xlu1 %1673 }
 0xa08   : > { %1676 = vst.msk [vmem:[%s3090_s14 + $0x4] sm:$0xf] %vm1516_vm12, %v1674_v36 }
 0xa0b   : > { %v1678_v16 = vpop.permute.xlu1 %1677 }
 0xa0c   : > { %v1680_v11 = vsel %vm1408_vm15, %v1678_v16, 0.0 }
 0xa0d   : > { %1681 = vadd.xlane.f32.xlu0 %v1680_v11 }
 0xa0f   : > { %v1685_v10 = vpop.permute.xlu1 %1684 }
 0xa10   : > { %v1687_v15 = vsel %vm1408_vm15, %v1685_v10, 0.0 }
 0xa13   : > { %v1703_v20 = vpop.permute.xlu1 %1702 }
 0xa17   : > { %v1714_v60 = vpop.permute.xlu1 %1713 }
 0xa1b   : > { %v1716_v12 = vpop.permute.xlu1 %1715 }
 0xa1c   : > { %v1717_v33 = vsel %vm1704_vm5, %v1714_v60, %v1716_v12 }
 0xa1d   : > { %v1719_v25 = vsel %vm1408_vm15, %v1717_v33, 0.0 }
 0xa1f   : > { %v1728_v62 = vpop.permute.xlu1 %1727 }
 0xa20   : > { %v1730_v23 = vsel %vm1408_vm15, %v1728_v62, 0.0 }
 0xa23   : > { %v1735_v9 = vpop.permute.xlu1 %1734  ;;  %1700 = vrot.lane.b32.xlu0 %v3080_v5, %s2087_s24  ;;  %v1671_v5 = vpop.xlane.xlu0 %1670 }
 0xa24   : > { %v1737_v13 = vsel %vm1408_vm15, %v1735_v9, 0.0  ;;  %v1672_v43 = vadd.f32 %v1671_v5, %v1654_v46 }
 0xa27   : > { %v1694_v32 = vpop.permute.xlu1 %1693 }
 0xa28   : > { %v1695_v54 = vrot.slane %v1694_v32, 4 }
 0xa2a   : > { %v1697_v19 = vsel %vm1696_vm0, %v1694_v32, %v1695_v54 }
 0xa2b   : > { %1699 = vst.msk [vmem:[%s3090_s14 + $0x4] sm:$0xf] %vm1535_vm13, %v1697_v19 }
 0xa42   : > { %1688 = vadd.xlane.f32.xlu0 %v1687_v15 }
 0xa46   : > { %1720 = vadd.xlane.f32.xlu0 %v1719_v25 }
 0xa4a   : > { %1731 = vadd.xlane.f32.xlu0 %v1730_v23 }
 0xa4e   : > { %1738 = vadd.xlane.f32.xlu0 %v1737_v13 }
 0xa9a   : > { %v1682_v28 = vpop.xlane.xlu0 %1681 }
 0xa9b   : > { %v1683_v27 = vadd.f32 %v1682_v28, %v1665_v35 }
 0xa9e   : > { %v1701_v0 = vpop.permute.xlu0 %1700 }
 0xa9f   : > { %v1705_v49 = vsel %vm1704_vm5, %v1701_v0, %v1703_v20 }
 0xaa0   : > { %v1707_v14 = vsel %vm1408_vm15, %v1705_v49, 0.0 }
 0xaa1   : > { %1708 = vadd.xlane.f32.xlu1 %v1707_v14 }
 0xab2   : > { %1723 = vrot.lane.b32.xlu1 %v3082_v40, %s2049_s11 }
 0xacf   : > { %v1689_v55 = vpop.xlane.xlu0 %1688 }
 0xad0   : > { %v1690_v31 = vadd.f32 %v1689_v55, %v1672_v43 }
 0xad3   : > { %v1721_v56 = vpop.xlane.xlu0 %1720 }
 0xad4   : > { %v1722_v58 = vadd.f32 %v1721_v56, %v1690_v31 }
 0xad7   : > { %v1732_v7 = vpop.xlane.xlu0 %1731 }
 0xadb   : > { %v1739_v51 = vpop.xlane.xlu0 %1738 }
 0xadc   : > { %v1740_v30 = vadd.f32 %v1739_v51, %v1722_v58 }
 0xb2e   : > { %v1709_v4 = vpop.xlane.xlu1 %1708 }
 0xb2f   : > { %v1710_v24 = vadd.f32 %v1709_v4, %v1683_v27 }
 0xb31   : > { %v1733_v45 = vadd.f32 %v1732_v7, %v1710_v24 }
 0xb32   : > { %v1724_v61 = vpop.permute.xlu1 %1723 }
 0xb33   : > { %v1741_v40 = vsel %vm325_vm3, %v1733_v45, %v1740_v30  ;;  %1726 = vst.msk [vmem:[%s3090_s14 + $0x4] sm:$0xf] %vm1554_vm1, %v1724_v61 }
 0xb34   : > { %1743 = vst.msk [vmem:[%s208_s17] sm:$0xf] %vm1742_vm14, %v1741_v40 }
 0xb35 PF: > { %s15_s15 = sadd.s32 1, %s1995_s15  }
 0xb36   : > { %p12_p4 = scmp.ge.s32.totalorder %s15_s15, 4  }
 0xb38   :  { %14 = sbr.rel (!%p12_p4) target bundleno = 1 (0x1), region = 74 }

</bundles_post_ra>
